<compile_context>
chip_gen: v6e
topology: v6e:2x2x1
jax: 0.10.0
libtpu: 0.0.40
codegen_flags: <defaults>
</compile_context>

<pallas_src>
import jax
import jax.numpy as jnp
from jax import lax
from jax.experimental import pallas as pl
from jax.experimental.pallas import tpu as pltpu


def _round_up(a, b):
    return ((a + b - 1) // b) * b


def model_forward(x, weight, bias):
    """x: (N, Cin, H, W) f32, weight: (Cout, Cin, KH, KW), bias: (Cout,).

    Returns NCHW (N, Cout, OH, OW) = conv(x) + bias - 4.0 (VALID padding).
    """
    N, Cin, H, W = x.shape
    Cout, _, KH, KW = weight.shape
    OH, OW = H - KH + 1, W - KW + 1
    R = Cin * KH               # patch rows actually used (= 14)
    PSLAB = OH * W             # W-strided output slab length (= 280)

    # (8,128)-aligned padded sizes -> dense, unmasked vector accesses.
    RP = _round_up(R, 128)                                   # 128 (MXU-native K)
    PP = _round_up(PSLAB, 128)                                # 384 (lane-dense out)
    CP = _round_up(Cout, 8)                                   # 16
    PW = PP + 128                                             # 512: covers +kw window
    XP = _round_up(max(H * W, (KH - 1) * W + PP), 128)        # 512

    # --- tiny host-side packing (a few cheap XLA ops on <100 KB of data) ---
    x_flat = jnp.zeros((N, Cin, XP), jnp.float32)
    x_flat = x_flat.at[:, :, : H * W].set(
        x.reshape(N, Cin, H * W).astype(jnp.float32))

    # w_stk[kw, co, c*KH + kh] = weight[co, c, kh, kw]; zero-padded elsewhere.
    w_stk = jnp.zeros((KW, CP, RP), jnp.float32)
    w_stk = w_stk.at[:, :Cout, :R].set(
        jnp.transpose(weight.astype(jnp.float32), (3, 0, 1, 2)).reshape(KW, Cout, R))

    # bias with the constant -4.0 folded in (padded rows stay 0, discarded later).
    b_mat = jnp.zeros((CP, 1), jnp.float32)
    b_mat = b_mat.at[:Cout, 0].set(bias.astype(jnp.float32) - jnp.float32(4.0))

    def kernel(x_ref, w_ref, b_ref, o_ref, patch_ref):
        # x_ref    : (1, Cin, XP)   flattened, zero-padded image (one batch elem)
        # w_ref    : (KW, CP, RP)   per-kw zero-padded weight slabs
        # b_ref    : (CP, 1)        bias - 4.0, zero-padded
        # o_ref    : (1, CP, PP)    W-strided conv slab (lane-dense output)
        # patch_ref: (RP, PW)       (Cin*KH)-row im2col scratch, stays in VMEM

        # One-time zero: rows >= R and lanes >= PP must stay 0 so the padded
        # weight rows never multiply stale VMEM. Scratch persists across steps.
        @pl.when(pl.program_id(0) == 0)
        def _():
            patch_ref[...] = jnp.zeros_like(patch_ref)

        # 14 contiguous full-width (384 = 3 unmasked vregs) row copies.
        r = 0
        for c in range(Cin):
            for kh in range(KH):
                s = kh * W
                patch_ref[r:r + 1, 0:PP] = x_ref[0, c:c + 1, s:s + PP]
                r += 1

        # kw handled by 7 matmuls against kw-shifted lane windows of the patch.
        acc = jnp.dot(w_ref[0], patch_ref[:, 0:PP],
                      preferred_element_type=jnp.float32)
        for kw in range(1, KW):
            acc = acc + jnp.dot(w_ref[kw], patch_ref[:, kw:kw + PP],
                                preferred_element_type=jnp.float32)
        o_ref[0] = acc + b_ref[...]

    flops = 2 * N * Cout * OH * OW * (Cin * KH * KW)
    bytes_accessed = 4 * (x_flat.size + w_stk.size + b_mat.size + N * CP * PP)

    out = pl.pallas_call(
        kernel,
        out_shape=jax.ShapeDtypeStruct((N, CP, PP), jnp.float32),
        grid=(N,),
        in_specs=[
            pl.BlockSpec((1, Cin, XP), lambda n: (n, 0, 0)),
            pl.BlockSpec((KW, CP, RP), lambda n: (0, 0, 0)),
            pl.BlockSpec((CP, 1), lambda n: (0, 0)),
        ],
        out_specs=pl.BlockSpec((1, CP, PP), lambda n: (n, 0, 0)),
        scratch_shapes=[pltpu.VMEM((RP, PW), jnp.float32)],
        compiler_params=pltpu.CompilerParams(
            dimension_semantics=("arbitrary",)),
        cost_estimate=pl.CostEstimate(
            flops=flops, transcendentals=0, bytes_accessed=bytes_accessed),
    )(x_flat, w_stk, b_mat)

    # valid part of the slab -> NCHW; slice + reshape only, no transpose.
    return out[:, :Cout, :PSLAB].reshape(N, Cout, OH, W)[:, :, :, :OW]


if __name__ == "__main__":
    key = jax.random.PRNGKey(0)
    kx, kw_key, kb_key = jax.random.split(key, 3)

    # shapes implied by the module: Conv2d(2, 9, 7) applied to (1, 2, 20, 20)
    N, Cin, H, W = 1, 2, 20, 20
    Cout, KH, KW = 9, 7, 7

    x = jax.random.normal(kx, (N, Cin, H, W), dtype=jnp.float32)
    weight = jax.random.normal(kw_key, (Cout, Cin, KH, KW), dtype=jnp.float32) * 0.1
    bias = jax.random.normal(kb_key, (Cout,), dtype=jnp.float32) * 0.1

    fwd = jax.jit(model_forward)
    y = jax.block_until_ready(fwd(x, weight, bias))
    assert y.shape == (N, Cout, H - KH + 1, W - KW + 1), y.shape

    # reference check vs XLA conv (same semantics as PyTorch Conv2d, VALID pad)
    y_ref = lax.conv_general_dilated(
        x, weight, window_strides=(1, 1), padding="VALID",
        dimension_numbers=("NCHW", "OIHW", "NCHW"),
    ) + bias.reshape(1, Cout, 1, 1) - 4.0
    assert jnp.allclose(y, y_ref, atol=1e-4, rtol=1e-4), float(
        jnp.max(jnp.abs(y - y_ref)))

    print("KERNEL_OK")
</pallas_src>

<mosaic_0001>
module attributes {stable_mosaic.version = 11 : i64} {
  func.func @kernel(%arg0: i32, %arg1: memref<1x2x512xf32, #tpu.memory_space<vmem>>, %arg2: memref<7x16x128xf32, #tpu.memory_space<vmem>>, %arg3: memref<16x1xf32, #tpu.memory_space<vmem>>, %arg4: memref<1x16x384xf32, #tpu.memory_space<vmem>>, %arg5: memref<128x512xf32, #tpu.memory_space<vmem>>) attributes {dimension_semantics = [#tpu.dimension_semantics<arbitrary>], iteration_bounds = array<i64: 1>, scalar_prefetch = 0 : i64, scratch_operands = 1 : i64, tpu.core_type = #tpu.core_type<tc>, window_params = [{transform_indices = @transform_0, window_bounds = array<i64: 1, 2, 512>}, {pipeline_mode = #tpu.pipeline_mode<synchronous>, transform_indices = @transform_1, window_bounds = array<i64: 7, 16, 128>}, {pipeline_mode = #tpu.pipeline_mode<synchronous>, transform_indices = @transform_2, window_bounds = array<i64: 16, 1>}, {transform_indices = @transform_3, window_bounds = array<i64: 1, 16, 384>}]} {
    %c0_i32 = arith.constant 0 : i32
    %0 = arith.cmpi eq, %arg0, %c0_i32 : i32
    %1 = arith.extui %0 : i1 to i32
    %c0_i32_0 = arith.constant 0 : i32
    %2 = arith.cmpi ne, %1, %c0_i32_0 : i32
    scf.if %2 {
      %cst_97 = arith.constant 0.000000e+00 : f32
      %85 = vector.broadcast %cst_97 : f32 to vector<128x512xf32>
      %c0_98 = arith.constant 0 : index
      %c0_99 = arith.constant 0 : index
      %86 = vector.load %arg5[%c0_98, %c0_99] : memref<128x512xf32, #tpu.memory_space<vmem>>, vector<128x512xf32>
      tpu.vector_store %arg5[%c0_98, %c0_99], %85 {strides = array<i32>} : memref<128x512xf32, #tpu.memory_space<vmem>>, vector<128x512xf32>,
    } else {
    }
    %c0 = arith.constant 0 : index
    %c0_1 = arith.constant 0 : index
    %c0_2 = arith.constant 0 : index
    %3 = vector.load %arg1[%c0, %c0_1, %c0_2] : memref<1x2x512xf32, #tpu.memory_space<vmem>>, vector<1x1x384xf32>
    %4 = vector.shape_cast %3 : vector<1x1x384xf32> to vector<1x384xf32>
    %c0_3 = arith.constant 0 : index
    %c0_4 = arith.constant 0 : index
    %5 = vector.load %arg5[%c0_3, %c0_4] : memref<128x512xf32, #tpu.memory_space<vmem>>, vector<1x384xf32>
    tpu.vector_store %arg5[%c0_3, %c0_4], %4 {strides = array<i32>} : memref<128x512xf32, #tpu.memory_space<vmem>>, vector<1x384xf32>,
    %c0_5 = arith.constant 0 : index
    %c0_6 = arith.constant 0 : index
    %c20 = arith.constant 20 : index
    %6 = vector.load %arg1[%c0_5, %c0_6, %c20] : memref<1x2x512xf32, #tpu.memory_space<vmem>>, vector<1x1x384xf32>
    %7 = vector.shape_cast %6 : vector<1x1x384xf32> to vector<1x384xf32>
    %c1 = arith.constant 1 : index
    %c0_7 = arith.constant 0 : index
    %8 = vector.load %arg5[%c1, %c0_7] : memref<128x512xf32, #tpu.memory_space<vmem>>, vector<1x384xf32>
    tpu.vector_store %arg5[%c1, %c0_7], %7 {strides = array<i32>} : memref<128x512xf32, #tpu.memory_space<vmem>>, vector<1x384xf32>,
    %c0_8 = arith.constant 0 : index
    %c0_9 = arith.constant 0 : index
    %c40 = arith.constant 40 : index
    %9 = vector.load %arg1[%c0_8, %c0_9, %c40] : memref<1x2x512xf32, #tpu.memory_space<vmem>>, vector<1x1x384xf32>
    %10 = vector.shape_cast %9 : vector<1x1x384xf32> to vector<1x384xf32>
    %c2 = arith.constant 2 : index
    %c0_10 = arith.constant 0 : index
    %11 = vector.load %arg5[%c2, %c0_10] : memref<128x512xf32, #tpu.memory_space<vmem>>, vector<1x384xf32>
    tpu.vector_store %arg5[%c2, %c0_10], %10 {strides = array<i32>} : memref<128x512xf32, #tpu.memory_space<vmem>>, vector<1x384xf32>,
    %c0_11 = arith.constant 0 : index
    %c0_12 = arith.constant 0 : index
    %c60 = arith.constant 60 : index
    %12 = vector.load %arg1[%c0_11, %c0_12, %c60] : memref<1x2x512xf32, #tpu.memory_space<vmem>>, vector<1x1x384xf32>
    %13 = vector.shape_cast %12 : vector<1x1x384xf32> to vector<1x384xf32>
    %c3 = arith.constant 3 : index
    %c0_13 = arith.constant 0 : index
    %14 = vector.load %arg5[%c3, %c0_13] : memref<128x512xf32, #tpu.memory_space<vmem>>, vector<1x384xf32>
    tpu.vector_store %arg5[%c3, %c0_13], %13 {strides = array<i32>} : memref<128x512xf32, #tpu.memory_space<vmem>>, vector<1x384xf32>,
    %c0_14 = arith.constant 0 : index
    %c0_15 = arith.constant 0 : index
    %c80 = arith.constant 80 : index
    %15 = vector.load %arg1[%c0_14, %c0_15, %c80] : memref<1x2x512xf32, #tpu.memory_space<vmem>>, vector<1x1x384xf32>
    %16 = vector.shape_cast %15 : vector<1x1x384xf32> to vector<1x384xf32>
    %c4 = arith.constant 4 : index
    %c0_16 = arith.constant 0 : index
    %17 = vector.load %arg5[%c4, %c0_16] : memref<128x512xf32, #tpu.memory_space<vmem>>, vector<1x384xf32>
    tpu.vector_store %arg5[%c4, %c0_16], %16 {strides = array<i32>} : memref<128x512xf32, #tpu.memory_space<vmem>>, vector<1x384xf32>,
    %c0_17 = arith.constant 0 : index
    %c0_18 = arith.constant 0 : index
    %c100 = arith.constant 100 : index
    %18 = vector.load %arg1[%c0_17, %c0_18, %c100] : memref<1x2x512xf32, #tpu.memory_space<vmem>>, vector<1x1x384xf32>
    %19 = vector.shape_cast %18 : vector<1x1x384xf32> to vector<1x384xf32>
    %c5 = arith.constant 5 : index
    %c0_19 = arith.constant 0 : index
    %20 = vector.load %arg5[%c5, %c0_19] : memref<128x512xf32, #tpu.memory_space<vmem>>, vector<1x384xf32>
    tpu.vector_store %arg5[%c5, %c0_19], %19 {strides = array<i32>} : memref<128x512xf32, #tpu.memory_space<vmem>>, vector<1x384xf32>,
    %c0_20 = arith.constant 0 : index
    %c0_21 = arith.constant 0 : index
    %c120 = arith.constant 120 : index
    %21 = vector.load %arg1[%c0_20, %c0_21, %c120] : memref<1x2x512xf32, #tpu.memory_space<vmem>>, vector<1x1x384xf32>
    %22 = vector.shape_cast %21 : vector<1x1x384xf32> to vector<1x384xf32>
    %c6 = arith.constant 6 : index
    %c0_22 = arith.constant 0 : index
    %23 = vector.load %arg5[%c6, %c0_22] : memref<128x512xf32, #tpu.memory_space<vmem>>, vector<1x384xf32>
    tpu.vector_store %arg5[%c6, %c0_22], %22 {strides = array<i32>} : memref<128x512xf32, #tpu.memory_space<vmem>>, vector<1x384xf32>,
    %c0_23 = arith.constant 0 : index
    %c1_24 = arith.constant 1 : index
    %c0_25 = arith.constant 0 : index
    %24 = vector.load %arg1[%c0_23, %c1_24, %c0_25] : memref<1x2x512xf32, #tpu.memory_space<vmem>>, vector<1x1x384xf32>
    %25 = vector.shape_cast %24 : vector<1x1x384xf32> to vector<1x384xf32>
    %c7 = arith.constant 7 : index
    %c0_26 = arith.constant 0 : index
    %26 = vector.load %arg5[%c7, %c0_26] : memref<128x512xf32, #tpu.memory_space<vmem>>, vector<1x384xf32>
    tpu.vector_store %arg5[%c7, %c0_26], %25 {strides = array<i32>} : memref<128x512xf32, #tpu.memory_space<vmem>>, vector<1x384xf32>,
    %c0_27 = arith.constant 0 : index
    %c1_28 = arith.constant 1 : index
    %c20_29 = arith.constant 20 : index
    %27 = vector.load %arg1[%c0_27, %c1_28, %c20_29] : memref<1x2x512xf32, #tpu.memory_space<vmem>>, vector<1x1x384xf32>
    %28 = vector.shape_cast %27 : vector<1x1x384xf32> to vector<1x384xf32>
    %c8 = arith.constant 8 : index
    %c0_30 = arith.constant 0 : index
    %29 = vector.load %arg5[%c8, %c0_30] : memref<128x512xf32, #tpu.memory_space<vmem>>, vector<1x384xf32>
    tpu.vector_store %arg5[%c8, %c0_30], %28 {strides = array<i32>} : memref<128x512xf32, #tpu.memory_space<vmem>>, vector<1x384xf32>,
    %c0_31 = arith.constant 0 : index
    %c1_32 = arith.constant 1 : index
    %c40_33 = arith.constant 40 : index
    %30 = vector.load %arg1[%c0_31, %c1_32, %c40_33] : memref<1x2x512xf32, #tpu.memory_space<vmem>>, vector<1x1x384xf32>
    %31 = vector.shape_cast %30 : vector<1x1x384xf32> to vector<1x384xf32>
    %c9 = arith.constant 9 : index
    %c0_34 = arith.constant 0 : index
    %32 = vector.load %arg5[%c9, %c0_34] : memref<128x512xf32, #tpu.memory_space<vmem>>, vector<1x384xf32>
    tpu.vector_store %arg5[%c9, %c0_34], %31 {strides = array<i32>} : memref<128x512xf32, #tpu.memory_space<vmem>>, vector<1x384xf32>,
    %c0_35 = arith.constant 0 : index
    %c1_36 = arith.constant 1 : index
    %c60_37 = arith.constant 60 : index
    %33 = vector.load %arg1[%c0_35, %c1_36, %c60_37] : memref<1x2x512xf32, #tpu.memory_space<vmem>>, vector<1x1x384xf32>
    %34 = vector.shape_cast %33 : vector<1x1x384xf32> to vector<1x384xf32>
    %c10 = arith.constant 10 : index
    %c0_38 = arith.constant 0 : index
    %35 = vector.load %arg5[%c10, %c0_38] : memref<128x512xf32, #tpu.memory_space<vmem>>, vector<1x384xf32>
    tpu.vector_store %arg5[%c10, %c0_38], %34 {strides = array<i32>} : memref<128x512xf32, #tpu.memory_space<vmem>>, vector<1x384xf32>,
    %c0_39 = arith.constant 0 : index
    %c1_40 = arith.constant 1 : index
    %c80_41 = arith.constant 80 : index
    %36 = vector.load %arg1[%c0_39, %c1_40, %c80_41] : memref<1x2x512xf32, #tpu.memory_space<vmem>>, vector<1x1x384xf32>
    %37 = vector.shape_cast %36 : vector<1x1x384xf32> to vector<1x384xf32>
    %c11 = arith.constant 11 : index
    %c0_42 = arith.constant 0 : index
    %38 = vector.load %arg5[%c11, %c0_42] : memref<128x512xf32, #tpu.memory_space<vmem>>, vector<1x384xf32>
    tpu.vector_store %arg5[%c11, %c0_42], %37 {strides = array<i32>} : memref<128x512xf32, #tpu.memory_space<vmem>>, vector<1x384xf32>,
    %c0_43 = arith.constant 0 : index
    %c1_44 = arith.constant 1 : index
    %c100_45 = arith.constant 100 : index
    %39 = vector.load %arg1[%c0_43, %c1_44, %c100_45] : memref<1x2x512xf32, #tpu.memory_space<vmem>>, vector<1x1x384xf32>
    %40 = vector.shape_cast %39 : vector<1x1x384xf32> to vector<1x384xf32>
    %c12 = arith.constant 12 : index
    %c0_46 = arith.constant 0 : index
    %41 = vector.load %arg5[%c12, %c0_46] : memref<128x512xf32, #tpu.memory_space<vmem>>, vector<1x384xf32>
    tpu.vector_store %arg5[%c12, %c0_46], %40 {strides = array<i32>} : memref<128x512xf32, #tpu.memory_space<vmem>>, vector<1x384xf32>,
    %c0_47 = arith.constant 0 : index
    %c1_48 = arith.constant 1 : index
    %c120_49 = arith.constant 120 : index
    %42 = vector.load %arg1[%c0_47, %c1_48, %c120_49] : memref<1x2x512xf32, #tpu.memory_space<vmem>>, vector<1x1x384xf32>
    %43 = vector.shape_cast %42 : vector<1x1x384xf32> to vector<1x384xf32>
    %c13 = arith.constant 13 : index
    %c0_50 = arith.constant 0 : index
    %44 = vector.load %arg5[%c13, %c0_50] : memref<128x512xf32, #tpu.memory_space<vmem>>, vector<1x384xf32>
    tpu.vector_store %arg5[%c13, %c0_50], %43 {strides = array<i32>} : memref<128x512xf32, #tpu.memory_space<vmem>>, vector<1x384xf32>,
    %c0_51 = arith.constant 0 : index
    %c0_52 = arith.constant 0 : index
    %c0_53 = arith.constant 0 : index
    %45 = vector.load %arg2[%c0_51, %c0_52, %c0_53] : memref<7x16x128xf32, #tpu.memory_space<vmem>>, vector<1x16x128xf32>
    %46 = vector.shape_cast %45 : vector<1x16x128xf32> to vector<16x128xf32>
    %c0_54 = arith.constant 0 : index
    %c0_55 = arith.constant 0 : index
    %47 = vector.load %arg5[%c0_54, %c0_55] : memref<128x512xf32, #tpu.memory_space<vmem>>, vector<128x384xf32>
    %cst = arith.constant dense<0.000000e+00> : vector<16x384xf32>
    %48 = tpu.matmul %46, %47, %cst {dimension_numbers = #tpu.dot_dimension_numbers<[1], [0], [0], [1], [0, 0, 1, 1], [], []>} : vector<16x128xf32>, vector<128x384xf32>, vector<16x384xf32> -> vector<16x384xf32>
    %c1_56 = arith.constant 1 : index
    %c0_57 = arith.constant 0 : index
    %c0_58 = arith.constant 0 : index
    %49 = vector.load %arg2[%c1_56, %c0_57, %c0_58] : memref<7x16x128xf32, #tpu.memory_space<vmem>>, vector<1x16x128xf32>
    %50 = vector.shape_cast %49 : vector<1x16x128xf32> to vector<16x128xf32>
    %c0_59 = arith.constant 0 : index
    %c1_60 = arith.constant 1 : index
    %51 = vector.load %arg5[%c0_59, %c1_60] : memref<128x512xf32, #tpu.memory_space<vmem>>, vector<128x384xf32>
    %cst_61 = arith.constant dense<0.000000e+00> : vector<16x384xf32>
    %52 = tpu.matmul %50, %51, %cst_61 {dimension_numbers = #tpu.dot_dimension_numbers<[1], [0], [0], [1], [0, 0, 1, 1], [], []>} : vector<16x128xf32>, vector<128x384xf32>, vector<16x384xf32> -> vector<16x384xf32>
    %53 = arith.addf %48, %52 : vector<16x384xf32>
    %c2_62 = arith.constant 2 : index
    %c0_63 = arith.constant 0 : index
    %c0_64 = arith.constant 0 : index
    %54 = vector.load %arg2[%c2_62, %c0_63, %c0_64] : memref<7x16x128xf32, #tpu.memory_space<vmem>>, vector<1x16x128xf32>
    %55 = vector.shape_cast %54 : vector<1x16x128xf32> to vector<16x128xf32>
    %c0_65 = arith.constant 0 : index
    %c2_66 = arith.constant 2 : index
    %56 = vector.load %arg5[%c0_65, %c2_66] : memref<128x512xf32, #tpu.memory_space<vmem>>, vector<128x384xf32>
    %cst_67 = arith.constant dense<0.000000e+00> : vector<16x384xf32>
    %57 = tpu.matmul %55, %56, %cst_67 {dimension_numbers = #tpu.dot_dimension_numbers<[1], [0], [0], [1], [0, 0, 1, 1], [], []>} : vector<16x128xf32>, vector<128x384xf32>, vector<16x384xf32> -> vector<16x384xf32>
    %58 = arith.addf %53, %57 : vector<16x384xf32>
    %c3_68 = arith.constant 3 : index
    %c0_69 = arith.constant 0 : index
    %c0_70 = arith.constant 0 : index
    %59 = vector.load %arg2[%c3_68, %c0_69, %c0_70] : memref<7x16x128xf32, #tpu.memory_space<vmem>>, vector<1x16x128xf32>
    %60 = vector.shape_cast %59 : vector<1x16x128xf32> to vector<16x128xf32>
    %c0_71 = arith.constant 0 : index
    %c3_72 = arith.constant 3 : index
    %61 = vector.load %arg5[%c0_71, %c3_72] : memref<128x512xf32, #tpu.memory_space<vmem>>, vector<128x384xf32>
    %cst_73 = arith.constant dense<0.000000e+00> : vector<16x384xf32>
    %62 = tpu.matmul %60, %61, %cst_73 {dimension_numbers = #tpu.dot_dimension_numbers<[1], [0], [0], [1], [0, 0, 1, 1], [], []>} : vector<16x128xf32>, vector<128x384xf32>, vector<16x384xf32> -> vector<16x384xf32>
    %63 = arith.addf %58, %62 : vector<16x384xf32>
    %c4_74 = arith.constant 4 : index
    %c0_75 = arith.constant 0 : index
    %c0_76 = arith.constant 0 : index
    %64 = vector.load %arg2[%c4_74, %c0_75, %c0_76] : memref<7x16x128xf32, #tpu.memory_space<vmem>>, vector<1x16x128xf32>
    %65 = vector.shape_cast %64 : vector<1x16x128xf32> to vector<16x128xf32>
    %c0_77 = arith.constant 0 : index
    %c4_78 = arith.constant 4 : index
    %66 = vector.load %arg5[%c0_77, %c4_78] : memref<128x512xf32, #tpu.memory_space<vmem>>, vector<128x384xf32>
    %cst_79 = arith.constant dense<0.000000e+00> : vector<16x384xf32>
    %67 = tpu.matmul %65, %66, %cst_79 {dimension_numbers = #tpu.dot_dimension_numbers<[1], [0], [0], [1], [0, 0, 1, 1], [], []>} : vector<16x128xf32>, vector<128x384xf32>, vector<16x384xf32> -> vector<16x384xf32>
    %68 = arith.addf %63, %67 : vector<16x384xf32>
    %c5_80 = arith.constant 5 : index
    %c0_81 = arith.constant 0 : index
    %c0_82 = arith.constant 0 : index
    %69 = vector.load %arg2[%c5_80, %c0_81, %c0_82] : memref<7x16x128xf32, #tpu.memory_space<vmem>>, vector<1x16x128xf32>
    %70 = vector.shape_cast %69 : vector<1x16x128xf32> to vector<16x128xf32>
    %c0_83 = arith.constant 0 : index
    %c5_84 = arith.constant 5 : index
    %71 = vector.load %arg5[%c0_83, %c5_84] : memref<128x512xf32, #tpu.memory_space<vmem>>, vector<128x384xf32>
    %cst_85 = arith.constant dense<0.000000e+00> : vector<16x384xf32>
    %72 = tpu.matmul %70, %71, %cst_85 {dimension_numbers = #tpu.dot_dimension_numbers<[1], [0], [0], [1], [0, 0, 1, 1], [], []>} : vector<16x128xf32>, vector<128x384xf32>, vector<16x384xf32> -> vector<16x384xf32>
    %73 = arith.addf %68, %72 : vector<16x384xf32>
    %c6_86 = arith.constant 6 : index
    %c0_87 = arith.constant 0 : index
    %c0_88 = arith.constant 0 : index
    %74 = vector.load %arg2[%c6_86, %c0_87, %c0_88] : memref<7x16x128xf32, #tpu.memory_space<vmem>>, vector<1x16x128xf32>
    %75 = vector.shape_cast %74 : vector<1x16x128xf32> to vector<16x128xf32>
    %c0_89 = arith.constant 0 : index
    %c6_90 = arith.constant 6 : index
    %76 = vector.load %arg5[%c0_89, %c6_90] : memref<128x512xf32, #tpu.memory_space<vmem>>, vector<128x384xf32>
    %cst_91 = arith.constant dense<0.000000e+00> : vector<16x384xf32>
    %77 = tpu.matmul %75, %76, %cst_91 {dimension_numbers = #tpu.dot_dimension_numbers<[1], [0], [0], [1], [0, 0, 1, 1], [], []>} : vector<16x128xf32>, vector<128x384xf32>, vector<16x384xf32> -> vector<16x384xf32>
    %78 = arith.addf %73, %77 : vector<16x384xf32>
    %c0_92 = arith.constant 0 : index
    %c0_93 = arith.constant 0 : index
    %79 = vector.load %arg3[%c0_92, %c0_93] : memref<16x1xf32, #tpu.memory_space<vmem>>, vector<16x1xf32>
    %80 = vector.broadcast %79 : vector<16x1xf32> to vector<16x384xf32>
    %81 = arith.addf %78, %80 : vector<16x384xf32>
    %c0_94 = arith.constant 0 : index
    %c0_95 = arith.constant 0 : index
    %c0_96 = arith.constant 0 : index
    %82 = vector.load %arg4[%c0_94, %c0_95, %c0_96] : memref<1x16x384xf32, #tpu.memory_space<vmem>>, vector<1x16x384xf32>
    %83 = vector.shape_cast %82 : vector<1x16x384xf32> to vector<16x384xf32>
    %84 = vector.shape_cast %81 : vector<16x384xf32> to vector<1x16x384xf32>
    tpu.vector_store %arg4[%c0_94, %c0_95, %c0_96], %84 {strides = array<i32>} : memref<1x16x384xf32, #tpu.memory_space<vmem>>, vector<1x16x384xf32>,
    return
  }
  func.func @transform_0(%arg0: i32) -> (i32, i32, i32) {
    %c0_i32 = arith.constant 0 : i32
    %c0_i32_0 = arith.constant 0 : i32
    %c0_i32_1 = arith.constant 0 : i32
    return %arg0, %c0_i32, %c0_i32_0 : i32, i32, i32
  }
  func.func @transform_1(%arg0: i32) -> (i32, i32, i32) {
    %c0_i32 = arith.constant 0 : i32
    %c0_i32_0 = arith.constant 0 : i32
    %c0_i32_1 = arith.constant 0 : i32
    %c0_i32_2 = arith.constant 0 : i32
    return %c0_i32, %c0_i32_0, %c0_i32_1 : i32, i32, i32
  }
  func.func @transform_2(%arg0: i32) -> (i32, i32) {
    %c0_i32 = arith.constant 0 : i32
    %c0_i32_0 = arith.constant 0 : i32
    %c0_i32_1 = arith.constant 0 : i32
    return %c0_i32, %c0_i32_0 : i32, i32
  }
  func.func @transform_3(%arg0: i32) -> (i32, i32, i32) {
    %c0_i32 = arith.constant 0 : i32
    %c0_i32_0 = arith.constant 0 : i32
    %c0_i32_1 = arith.constant 0 : i32
    return %arg0, %c0_i32, %c0_i32_0 : i32, i32, i32
  }
}

</mosaic_0001>

<bundles_post_ra>
// kernel: model_forward.1
= control target key start
LH: loop header
LB: loop body
LE: loop exit
PB: predicated region body
PF: predicated region fallthrough
CT: control target
= control target key end

     0   :  { %v4169_v2 = vmov 0.0   ;;  %s4170_s16 = smov 68   ;;  %s4171_s17 = smov 108   ;;  %v83_v5 = vlaneseq  ;;  %vm116_vm1 = vcmask 556032   ;;  %vm94_vm2 = vcmask 883712   ;;  %s5651_s0 = inlined_call_operand.vmem [shape: f32[1,2,512], index: 0, kind: input, shape index: {}]   ;;  %s5652_s1 = inlined_call_operand.vmem [shape: f32[7,16,128], index: 1, kind: input, shape index: {}]   ;;  %s5653_s2 = inlined_call_operand.vmem [shape: f32[16,1], index: 2, kind: input, shape index: {}]   ;;  %s5654_s3 = inlined_call_operand.vmem [shape: f32[1,16,384], index: 3, kind: output, shape index: {}]  }
   0x1   :  { %v111_v0 = vld [vmem:[%s5651_s0] ss:$2 sm:$0xf]  ;;  %21 = vst [vmem:[#allocation2 + $0x18] sm:$0xff] %v4169_v2  ;;  %18 = vst [vmem:[#allocation2] sm:$0xff] %v4169_v2  ;;  %691 = vmatprep.mubr.f32.mxu0 %v4169_v2  ;;  %s4172_s22 = smov 48  }
   0x2   :  { %v89_v1 = vld [vmem:[%s5651_s0] ss:$2 sm:$0xf]  ;;  %19 = vst [vmem:[#allocation2 + $0x8] sm:$0xff] %v4169_v2  ;;  %20 = vst [vmem:[#allocation2 + $0x10] sm:$0xff] %v4169_v2  ;;  %113 = vrot.lane.b32.xlu1 %v111_v0, %s4170_s16  ;;  %s4173_s23 = smov 88  }
   0x3   :  { %22 = vst [vmem:[#allocation2 + $0x20] sm:$0xff] %v4169_v2  ;;  %23 = vst [vmem:[#allocation2 + $0x28] sm:$0xff] %v4169_v2  ;;  %91 = vrot.lane.b32.xlu0 %v89_v1, %s4171_s17  ;;  %v122_v3 = vld [vmem:[%s5651_s0] ss:$2 sm:$0xf]  ;;  %vm4229_vm0 = vcmp.lt.s32.totalorder %v83_v5, 384 }
   0x4   :  { %24 = vst [vmem:[#allocation2 + $0x30] sm:$0xff] %v4169_v2  ;;  %v100_v4 = vld [vmem:[%s5651_s0] ss:$2 sm:$0xf]  ;;  %s4174_s5 = smov 8   ;;  %s4175_s6 = smov 28  }
   0x5   :  { %v144_v6 = vld [vmem:[%s5651_s0] ss:$2 sm:$0xf]  ;;  %v2889_v10 = vld [vmem:[%s5651_s0 + $0x1] ss:$2 sm:$0x7] }
   0x6   :  { %124 = vrot.lane.b32.xlu1 %v122_v3, %s4172_s22  ;;  %v133_v7 = vld [vmem:[%s5651_s0] ss:$2 sm:$0xf]  ;;  %158 = vst.msk [vmem:[#allocation2 + $0x7] ss:$8 sm:$0x7] %vm4229_vm0, %v2889_v10 }
   0x7   :  { %102 = vrot.lane.b32.xlu0 %v100_v4, %s4173_s23  ;;  %v82_v9 = vld [vmem:[%s5651_s0] ss:$2 sm:$0x7]  ;;  %v2891_v11 = vld [vmem:[%s5651_s0 + $0x1] ss:$2 sm:$0xf] }
   0x8   :  { %87 = vst.msk [vmem:[#allocation2] ss:$8 sm:$0x7] %vm4229_vm0, %v82_v9  ;;  %v2890_v12 = vld [vmem:[%s5651_s0 + $0x1] ss:$2 sm:$0xf] }
   0x9   :  { %v2893_v13 = vld [vmem:[%s5651_s0 + $0x1] ss:$2 sm:$0xf]  ;;  %vm127_vm3 = vcmask 392192   ;;  %vm105_vm4 = vcmask 719872   ;;  %vm149_vm5 = vcmask 64512  }
   0xa   :  { %146 = vrot.lane.b32.xlu1 %v144_v6, %s4174_s5  ;;  %v2892_v14 = vld [vmem:[%s5651_s0 + $0x1] ss:$2 sm:$0xf]  ;;  %vm138_vm6 = vcmask 228352   ;;  %v4416_v0 = vld [vmem:[%s5652_s1 + $0x10] sm:$0xff]  ;;  %vm530_vm7 = vcmask 1039360  }
   0xb   :  { %135 = vrot.lane.b32.xlu0 %v133_v7, %s4175_s6  ;;  %v2895_v15 = vld [vmem:[%s5651_s0 + $0x1] ss:$2 sm:$0xf]  ;;  %3066 = vmatprep.mubr.f32.mxu1 %v4416_v0  ;;  %s4179_s25 = smov 124   ;;  %vm1062_vm8 = vcmask 1031168   ;;  %s4180_s30 = smov 123  }
   0xc   :  { %v2894_v16 = vld [vmem:[%s5651_s0 + $0x1] ss:$2 sm:$0xf]  ;;  %s4177_s0 = smov 126   ;;  %vm1448_vm9 = vcmask 1022976   ;;  %s4181_s10 = smov 122  }
   0xd   :  { %vm1834_vm10 = vcmask 1014784   ;;  %vm2220_vm11 = vcmask 1006592   ;;  %vm2606_vm12 = vcmask 998400  }
   0xe   :  { %173 = vrot.lane.b32.xlu1 %v2891_v11, %s4173_s23 }
   0xf   :  { %163 = vrot.lane.b32.xlu0 %v2890_v12, %s4171_s17  ;;  %s4176_s17 = smov 127  }
  0x12   :  { %193 = vrot.lane.b32.xlu1 %v2893_v13, %s4172_s22  ;;  %s4178_s22 = smov 125  }
  0x13   :  { %183 = vrot.lane.b32.xlu0 %v2892_v14, %s4170_s16 }
  0x16   :  { %213 = vrot.lane.b32.xlu1 %v2895_v15, %s4174_s5 }
  0x17   :  { %203 = vrot.lane.b32.xlu0 %v2894_v16, %s4175_s6 }
  0x1a   :  { %3294 = vrot.lane.b32.xlu1 %v4169_v2, %s4176_s17 }
  0x1b   :  { %3304 = vrot.lane.b32.xlu0 %v4169_v2, %s4176_s17 }
  0x1e   :  { %3299 = vrot.lane.b32.xlu1 %v4169_v2, %s4176_s17 }
  0x1f   :  { %3314 = vrot.lane.b32.xlu0 %v4169_v2, %s4176_s17 }
  0x22   :  { %3309 = vrot.lane.b32.xlu1 %v4169_v2, %s4176_s17 }
  0x23   :  { %3324 = vrot.lane.b32.xlu0 %v4169_v2, %s4176_s17 }
  0x26   :  { %3319 = vrot.lane.b32.xlu1 %v4169_v2, %s4176_s17 }
  0x27   :  { %3334 = vrot.lane.b32.xlu0 %v4169_v2, %s4176_s17 }
  0x2a   :  { %3329 = vrot.lane.b32.xlu1 %v4169_v2, %s4176_s17 }
  0x2b   :  { %3344 = vrot.lane.b32.xlu0 %v4169_v2, %s4176_s17 }
  0x2e   :  { %3339 = vrot.lane.b32.xlu1 %v4169_v2, %s4176_s17 }
  0x2f   :  { %3354 = vrot.lane.b32.xlu0 %v4169_v2, %s4176_s17 }
  0x32   :  { %3349 = vrot.lane.b32.xlu1 %v4169_v2, %s4176_s17 }
  0x33   :  { %3364 = vrot.lane.b32.xlu0 %v4169_v2, %s4176_s17 }
  0x36   :  { %3359 = vrot.lane.b32.xlu1 %v4169_v2, %s4176_s17 }
  0x37   :  { %3374 = vrot.lane.b32.xlu0 %v4169_v2, %s4176_s17 }
  0x3a   :  { %3369 = vrot.lane.b32.xlu1 %v4169_v2, %s4176_s17 }
  0x3b   :  { %3384 = vrot.lane.b32.xlu0 %v4169_v2, %s4176_s17 }
  0x3e   :  { %3379 = vrot.lane.b32.xlu1 %v4169_v2, %s4176_s17 }
  0x3f   :  { %3394 = vrot.lane.b32.xlu0 %v4169_v2, %s4176_s17 }
  0x42   :  { %3389 = vrot.lane.b32.xlu1 %v4169_v2, %s4176_s17 }
  0x43   :  { %3404 = vrot.lane.b32.xlu0 %v4169_v2, %s4176_s17 }
  0x46   :  { %3399 = vrot.lane.b32.xlu1 %v4169_v2, %s4176_s17 }
  0x47   :  { %3414 = vrot.lane.b32.xlu0 %v4169_v2, %s4176_s17 }
  0x4a   :  { %3409 = vrot.lane.b32.xlu1 %v4169_v2, %s4176_s17 }
  0x4b   :  { %3424 = vrot.lane.b32.xlu0 %v4169_v2, %s4176_s17 }
  0x4e   :  { %3419 = vrot.lane.b32.xlu1 %v4169_v2, %s4176_s17 }
  0x4f   :  { %3434 = vrot.lane.b32.xlu0 %v4169_v2, %s4176_s17 }
  0x52   :  { %3429 = vrot.lane.b32.xlu1 %v4169_v2, %s4176_s17 }
  0x53   :  { %3439 = vrot.lane.b32.xlu0 %v4169_v2, %s4177_s0 }
  0x56   :  { %3449 = vrot.lane.b32.xlu1 %v4169_v2, %s4177_s0 }
  0x57   :  { %3444 = vrot.lane.b32.xlu0 %v4169_v2, %s4177_s0 }
  0x5a   :  { %3459 = vrot.lane.b32.xlu1 %v4169_v2, %s4177_s0 }
  0x5b   :  { %3454 = vrot.lane.b32.xlu0 %v4169_v2, %s4177_s0 }
  0x5e   :  { %3469 = vrot.lane.b32.xlu1 %v4169_v2, %s4177_s0 }
  0x5f   :  { %3464 = vrot.lane.b32.xlu0 %v4169_v2, %s4177_s0 }
  0x62   :  { %3479 = vrot.lane.b32.xlu1 %v4169_v2, %s4177_s0 }
  0x63   :  { %3474 = vrot.lane.b32.xlu0 %v4169_v2, %s4177_s0 }
  0x66   :  { %3489 = vrot.lane.b32.xlu1 %v4169_v2, %s4177_s0 }
  0x67   :  { %3484 = vrot.lane.b32.xlu0 %v4169_v2, %s4177_s0 }
  0x6a   :  { %3499 = vrot.lane.b32.xlu1 %v4169_v2, %s4177_s0 }
  0x6b   :  { %3494 = vrot.lane.b32.xlu0 %v4169_v2, %s4177_s0 }
  0x74   :  { %v114_v17 = vpop.permute.xlu1 %113 }
  0x75   :  { %v92_v18 = vpop.permute.xlu0 %91  ;;  %v115_v19 = vrot.slane %v114_v17, 1 }
  0x76   :  { %v93_v20 = vrot.slane %v92_v18, 1 }
  0x77   :  { %v117_v21 = vsel %vm116_vm1, %v114_v17, %v115_v19 }
  0x78   :  { %v95_v22 = vsel %vm94_vm2, %v92_v18, %v93_v20  ;;  %120 = vst.msk [vmem:[#allocation2 + $0x3] ss:$8 sm:$0x7] %vm4229_vm0, %v117_v21  ;;  %v125_v23 = vpop.permute.xlu1 %124 }
  0x79   :  { %98 = vst.msk [vmem:[#allocation2 + $0x1] ss:$8 sm:$0x7] %vm4229_vm0, %v95_v22  ;;  %v103_v24 = vpop.permute.xlu0 %102  ;;  %v126_v25 = vrot.slane %v125_v23, 1 }
  0x7a   :  { %v104_v26 = vrot.slane %v103_v24, 1 }
  0x7b   :  { %v128_v27 = vsel %vm127_vm3, %v125_v23, %v126_v25 }
  0x7c   :  { %v106_v28 = vsel %vm105_vm4, %v103_v24, %v104_v26  ;;  %131 = vst.msk [vmem:[#allocation2 + $0x4] ss:$8 sm:$0x7] %vm4229_vm0, %v128_v27  ;;  %v147_v29 = vpop.permute.xlu1 %146 }
  0x7d   :  { %109 = vst.msk [vmem:[#allocation2 + $0x2] ss:$8 sm:$0x7] %vm4229_vm0, %v106_v28  ;;  %v136_v30 = vpop.permute.xlu0 %135  ;;  %v148_v31 = vrot.slane %v147_v29, 1 }
  0x7e   :  { %v137_v32 = vrot.slane %v136_v30, 1 }
  0x7f   :  { %v150_v33 = vsel %vm149_vm5, %v147_v29, %v148_v31 }
  0x80   :  { %v139_v34 = vsel %vm138_vm6, %v136_v30, %v137_v32  ;;  %153 = vst.msk [vmem:[#allocation2 + $0x6] ss:$8 sm:$0x7] %vm4229_vm0, %v150_v33  ;;  %v174_v35 = vpop.permute.xlu1 %173 }
  0x81   :  { %142 = vst.msk [vmem:[#allocation2 + $0x5] ss:$8 sm:$0x7] %vm4229_vm0, %v139_v34  ;;  %v164_v36 = vpop.permute.xlu0 %163  ;;  %v175_v37 = vrot.slane %v174_v35, 1 }
  0x82   :  { %v165_v38 = vrot.slane %v164_v36, 1 }
  0x83   :  { %v176_v39 = vsel %vm105_vm4, %v174_v35, %v175_v37 }
  0x84   :  { %v166_v40 = vsel %vm94_vm2, %v164_v36, %v165_v38  ;;  %179 = vst.msk [vmem:[#allocation2 + $0x21] ss:$8 sm:$0x7] %vm4229_vm0, %v176_v39  ;;  %v194_v41 = vpop.permute.xlu1 %193 }
  0x85   :  { %169 = vst.msk [vmem:[#allocation2 + $0x20] ss:$8 sm:$0x7] %vm4229_vm0, %v166_v40  ;;  %v184_v42 = vpop.permute.xlu0 %183  ;;  %v195_v43 = vrot.slane %v194_v41, 1 }
  0x86   :  { %v185_v44 = vrot.slane %v184_v42, 1 }
  0x87   :  { %v196_v45 = vsel %vm127_vm3, %v194_v41, %v195_v43 }
  0x88   :  { %v186_v46 = vsel %vm116_vm1, %v184_v42, %v185_v44  ;;  %v4371_v47 = vld [vmem:[#allocation2 + $0x8] sm:$0xff]  ;;  %v4373_v48 = vld [vmem:[#allocation2] sm:$0xff]  ;;  %199 = vst.msk [vmem:[#allocation2 + $0x23] ss:$8 sm:$0x7] %vm4229_vm0, %v196_v45  ;;  %v214_v49 = vpop.permute.xlu1 %213  ;;  %v4385_v55 = vld [vmem:[#allocation2 + $0x10] sm:$0xff] }
  0x89   :  { %189 = vst.msk [vmem:[#allocation2 + $0x22] ss:$8 sm:$0x7] %vm4229_vm0, %v186_v46  ;;  %v204_v50 = vpop.permute.xlu0 %203  ;;  %404 = vrot.lane.b32.xlu1 %v4371_v47, %s4176_s17  ;;  %402 = vrot.lane.b32.xlu0 %v4373_v48, %s4176_s17  ;;  %v215_v51 = vrot.slane %v214_v49, 1 }
  0x8a   :  { %v205_v52 = vrot.slane %v204_v50, 1 }
  0x8b   :  { %v216_v53 = vsel %vm149_vm5, %v214_v49, %v215_v51 }
  0x8c   :  { %v206_v54 = vsel %vm138_vm6, %v204_v50, %v205_v52  ;;  %219 = vst.msk [vmem:[#allocation2 + $0x25] ss:$8 sm:$0x7] %vm4229_vm0, %v216_v53  ;;  %v4391_v56 = vpop.permute.xlu1 %3294 }
  0x8d   :  { %209 = vst.msk [vmem:[#allocation2 + $0x24] ss:$8 sm:$0x7] %vm4229_vm0, %v206_v54  ;;  %v4393_v57 = vpop.permute.xlu0 %3304  ;;  %406 = vrot.lane.b32.xlu0 %v4385_v55, %s4176_s17 }
  0x90   :  { %v4397_v58 = vpop.permute.xlu1 %3299 }
  0x91   :  { %v4399_v59 = vpop.permute.xlu0 %3314 }
  0x94   :  { %v4401_v60 = vld [vmem:[#allocation2 + $0x28] sm:$0xff]  ;;  %v4403_v61 = vld [vmem:[#allocation2 + $0x20] sm:$0xff]  ;;  %v4405_v62 = vpop.permute.xlu1 %3309  ;;  %v4419_v1 = vld [vmem:[#allocation2 + $0x30] sm:$0xff] }
  0x95   :  { %v4407_v63 = vpop.permute.xlu0 %3324  ;;  %412 = vrot.lane.b32.xlu1 %v4401_v60, %s4176_s17  ;;  %410 = vrot.lane.b32.xlu0 %v4403_v61, %s4176_s17 }
  0x98   :  { %v4421_v3 = vpop.permute.xlu1 %3319 }
  0x99   :  { %v4423_v4 = vpop.permute.xlu0 %3334  ;;  %934 = vrot.lane.b32.xlu1 %v4373_v48, %s4177_s0  ;;  %414 = vrot.lane.b32.xlu0 %v4419_v1, %s4176_s17 }
  0x9c   :  { %v4429_v5 = vpop.permute.xlu1 %3329 }
  0x9d   :  { %v4431_v6 = vpop.permute.xlu0 %3344  ;;  %938 = vrot.lane.b32.xlu1 %v4385_v55, %s4177_s0  ;;  %936 = vrot.lane.b32.xlu0 %v4371_v47, %s4177_s0 }
  0xa0   :  { %v4437_v7 = vpop.permute.xlu1 %3339 }
  0xa1   :  { %v4439_v8 = vpop.permute.xlu0 %3354  ;;  %942 = vrot.lane.b32.xlu1 %v4403_v61, %s4177_s0  ;;  %944 = vrot.lane.b32.xlu0 %v4401_v60, %s4177_s0 }
  0xa4   :  { %v4445_v9 = vpop.permute.xlu1 %3349 }
  0xa5   :  { %v4447_v10 = vpop.permute.xlu0 %3364  ;;  %946 = vrot.lane.b32.xlu1 %v4419_v1, %s4177_s0  ;;  %3504 = vrot.lane.b32.xlu0 %v4169_v2, %s4177_s0 }
  0xa8   :  { %v4453_v11 = vpop.permute.xlu1 %3359 }
  0xa9   :  { %v4455_v12 = vpop.permute.xlu0 %3374  ;;  %3509 = vrot.lane.b32.xlu1 %v4169_v2, %s4177_s0  ;;  %3514 = vrot.lane.b32.xlu0 %v4169_v2, %s4177_s0 }
  0xac   :  { %v4461_v13 = vpop.permute.xlu1 %3369 }
  0xad   :  { %v4463_v14 = vpop.permute.xlu0 %3384  ;;  %3519 = vrot.lane.b32.xlu1 %v4169_v2, %s4177_s0  ;;  %3524 = vrot.lane.b32.xlu0 %v4169_v2, %s4177_s0 }
  0xae   :  { %v3387_v51 = vunpack.i.h.bf16 %v4463_v14  ;;  %v3386_v52 = vunpack.i.l.bf16 %v4463_v14 }
  0xb0   :  { %v4469_v15 = vpop.permute.xlu1 %3379 }
  0xb1   :  { %v4471_v16 = vpop.permute.xlu0 %3394  ;;  %3529 = vrot.lane.b32.xlu1 %v4169_v2, %s4177_s0  ;;  %3534 = vrot.lane.b32.xlu0 %v4169_v2, %s4177_s0 }
  0xb2   :  { %v3397_v41 = vunpack.i.h.bf16 %v4471_v16  ;;  %v3396_v42 = vunpack.i.l.bf16 %v4471_v16 }
  0xb4   :  { %v4477_v17 = vpop.permute.xlu1 %3389 }
  0xb5   :  { %v4479_v18 = vpop.permute.xlu0 %3404  ;;  %3539 = vrot.lane.b32.xlu1 %v4169_v2, %s4177_s0  ;;  %3544 = vrot.lane.b32.xlu0 %v4169_v2, %s4177_s0  ;;  %v3392_v14 = vunpack.i.h.bf16 %v4477_v17 }
  0xb6   :  { %v3407_v33 = vunpack.i.h.bf16 %v4479_v18  ;;  %v3406_v34 = vunpack.i.l.bf16 %v4479_v18 }
  0xb8   :  { %v4485_v19 = vpop.permute.xlu1 %3399  ;;  %v569_v50 = vsel %vm530_vm7, %v3406_v34, %v3407_v33  ;;  %v3356_v33 = vunpack.i.l.bf16 %v4439_v8 }
  0xb9   :  { %v3415_v20 = vpop.permute.xlu0 %3414  ;;  %3549 = vrot.lane.b32.xlu1 %v4169_v2, %s4177_s0  ;;  %3554 = vrot.lane.b32.xlu0 %v4169_v2, %s4177_s0  ;;  %v3402_v53 = vunpack.i.h.bf16 %v4485_v19  ;;  %v3401_v16 = vunpack.i.l.bf16 %v4485_v19  ;;  %v3391_v19 = vunpack.i.l.bf16 %v4477_v17  ;;  %v3367_v17 = vunpack.i.h.bf16 %v4447_v10 }
  0xba   :  { %v3417_v27 = vunpack.i.h.bf16 %v3415_v20  ;;  %v3416_v28 = vunpack.i.l.bf16 %v3415_v20  ;;  %v566_v20 = vsel %vm530_vm7, %v3396_v42, %v3397_v41 }
  0xbc   :  { %v3410_v21 = vpop.permute.xlu1 %3409  ;;  %v572_v40 = vsel %vm530_vm7, %v3416_v28, %v3417_v27  ;;  %v3381_v27 = vunpack.i.l.bf16 %v4469_v15 }
  0xbd   :  { %v3425_v22 = vpop.permute.xlu0 %3424  ;;  %3559 = vrot.lane.b32.xlu1 %v4169_v2, %s4177_s0  ;;  %3564 = vrot.lane.b32.xlu0 %v4169_v2, %s4177_s0  ;;  %v3412_v43 = vunpack.i.h.bf16 %v3410_v21  ;;  %v3411_v46 = vunpack.i.l.bf16 %v3410_v21  ;;  %v3377_v21 = vunpack.i.h.bf16 %v4455_v12 }
  0xbe   :  { %v3427_v23 = vunpack.i.h.bf16 %v3425_v22  ;;  %v3426_v24 = vunpack.i.l.bf16 %v3425_v22 }
  0xbf   :  { %v571_v18 = vsel %vm530_vm7, %v3412_v43, %v3416_v28  ;;  %v570_v22 = vsel %vm530_vm7, %v3411_v46, %v3412_v43  ;;  %v3366_v28 = vunpack.i.l.bf16 %v4447_v10  ;;  %v3336_v43 = vunpack.i.l.bf16 %v4423_v4 }
  0xc0   :  { %v3420_v25 = vpop.permute.xlu1 %3419  ;;  %v575_v32 = vsel %vm530_vm7, %v3426_v24, %v3427_v23  ;;  %v3376_v23 = vunpack.i.l.bf16 %v4455_v12  ;;  %v565_v12 = vsel %vm530_vm7, %v3392_v14, %v3396_v42  ;;  %v3337_v42 = vunpack.i.h.bf16 %v4423_v4 }
  0xc1   :  { %v3435_v26 = vpop.permute.xlu0 %3434  ;;  %3569 = vrot.lane.b32.xlu1 %v4169_v2, %s4177_s0  ;;  %3574 = vrot.lane.b32.xlu0 %v4169_v2, %s4177_s0  ;;  %v3422_v35 = vunpack.i.h.bf16 %v3420_v25  ;;  %v3421_v37 = vunpack.i.l.bf16 %v3420_v25  ;;  %v563_v25 = vsel %vm530_vm7, %v3386_v52, %v3387_v51  ;;  %v3342_v51 = vunpack.i.h.bf16 %v4437_v7 }
  0xc2   :  { %v3437_v29 = vunpack.i.h.bf16 %v3435_v26  ;;  %v3436_v30 = vunpack.i.l.bf16 %v3435_v26  ;;  %v567_v26 = vsel %vm530_vm7, %v3401_v16, %v3402_v53  ;;  %v3317_v16 = vunpack.i.h.bf16 %v4399_v59 }
  0xc3   :  { %v574_v49 = vsel %vm530_vm7, %v3422_v35, %v3426_v24  ;;  %v573_v54 = vsel %vm530_vm7, %v3421_v37, %v3422_v35  ;;  %v568_v24 = vsel %vm530_vm7, %v3402_v53, %v3406_v34  ;;  %v3372_v34 = vunpack.i.h.bf16 %v4461_v13 }
  0xc4   :  { %v578_v31 = vsel %vm530_vm7, %v3436_v30, %v3437_v29  ;;  %v3430_v36 = vpop.permute.xlu1 %3429  ;;  %v3382_v29 = vunpack.i.h.bf16 %v4469_v15  ;;  %v3371_v15 = vunpack.i.l.bf16 %v4461_v13  ;;  %v3347_v37 = vunpack.i.h.bf16 %v4431_v6 }
  0xc5   :  { %3034 = vmatprep.subr.mxu1 %v578_v31  ;;  %3579 = vrot.lane.b32.xlu1 %v4169_v2, %s4177_s0  ;;  %v3432_v38 = vunpack.i.h.bf16 %v3430_v36  ;;  %v3431_v39 = vunpack.i.l.bf16 %v3430_v36  ;;  %v4547_v35 = vpop.permute.xlu0 %3439  ;;  %v557_v36 = vsel %vm530_vm7, %v3366_v28, %v3367_v17  ;;  %v559_v13 = vsel %vm530_vm7, %v3372_v34, %v3376_v23 }
  0xc6   :  { %1320 = vrot.lane.b32.xlu0 %v4373_v48, %s4178_s22  ;;  %3035 = vmatpush3.msra.mxu1 %v578_v31  ;;  %v564_v31 = vsel %vm530_vm7, %v3391_v19, %v3392_v14  ;;  %v561_v10 = vsel %vm530_vm7, %v3381_v27, %v3382_v29  ;;  %v3341_v53 = vunpack.i.l.bf16 %v4437_v7  ;;  %v3306_v19 = vunpack.i.l.bf16 %v4393_v57 }
  0xc7   :  { %3036 = vmatprep.subr.mxu1 %v575_v32  ;;  %v577_v44 = vsel %vm530_vm7, %v3432_v38, %v3436_v30  ;;  %v576_v45 = vsel %vm530_vm7, %v3431_v39, %v3432_v38  ;;  %v560_v30 = vsel %vm530_vm7, %v3376_v23, %v3377_v21  ;;  %v3346_v38 = vunpack.i.l.bf16 %v4431_v6 }
  0xc8   :  { %3037 = vmatpush3.msra.mxu1 %v575_v32  ;;  %627 = vmatprep.subr.mxu0 %v577_v44  ;;  %v3357_v32 = vunpack.i.h.bf16 %v4439_v8  ;;  %v562_v8 = vsel %vm530_vm7, %v3382_v29, %v3386_v52  ;;  %v3362_v39 = vunpack.i.h.bf16 %v4453_v11  ;;  %v3352_v44 = vunpack.i.h.bf16 %v4445_v9  ;;  %v4594_v21 = vpop.permute.xlu1 %3449 }
  0xc9   :  { %3038 = vmatprep.subr.mxu1 %v572_v40  ;;  %1322 = vrot.lane.b32.xlu1 %v4371_v47, %s4178_s22  ;;  %v558_v6 = vsel %vm530_vm7, %v3371_v15, %v3372_v34  ;;  %v551_v46 = vsel %vm530_vm7, %v3346_v38, %v3347_v37  ;;  %v550_v14 = vsel %vm530_vm7, %v3342_v51, %v3346_v38  ;;  %v3307_v23 = vunpack.i.h.bf16 %v4393_v57 }
  0xca   :  { %1324 = vrot.lane.b32.xlu0 %v4385_v55, %s4178_s22  ;;  %628 = vmatpush1.msra.mxu0 %v576_v45  ;;  %v554_v41 = vsel %vm530_vm7, %v3356_v33, %v3357_v32  ;;  %v3351_v45 = vunpack.i.l.bf16 %v4445_v9  ;;  %v556_v4 = vsel %vm530_vm7, %v3362_v39, %v3366_v28  ;;  %v553_v9 = vsel %vm530_vm7, %v3352_v44, %v3356_v33 }
  0xcb   :  { %3039 = vmatpush3.msra.mxu1 %v572_v40  ;;  %629 = vmatprep.subr.mxu0 %v574_v49  ;;  %v3361_v40 = vunpack.i.l.bf16 %v4453_v11  ;;  %v4571_v11 = vpop.permute.xlu0 %3444  ;;  %v3327_v49 = vunpack.i.h.bf16 %v4407_v63  ;;  %v3311_v57 = vunpack.i.l.bf16 %v4405_v62  ;;  %v3302_v17 = vunpack.i.h.bf16 %v4397_v58 }
  0xcc   :  { %3040 = vmatprep.subr.mxu1 %v569_v50  ;;  %630 = vmatpush1.msra.mxu0 %v573_v54  ;;  %v548_v54 = vsel %vm530_vm7, %v3336_v43, %v3337_v42  ;;  %v552_v7 = vsel %vm530_vm7, %v3351_v45, %v3352_v44  ;;  %v539_v29 = vsel %vm530_vm7, %v3306_v19, %v3307_v23 }
  0xcd   :  { %3041 = vmatpush3.msra.mxu1 %v569_v50  ;;  %631 = vmatprep.subr.mxu0 %v571_v18  ;;  %v3326_v50 = vunpack.i.l.bf16 %v4407_v63  ;;  %v555_v52 = vsel %vm530_vm7, %v3361_v40, %v3362_v39  ;;  %v3316_v18 = vunpack.i.l.bf16 %v4399_v59  ;;  %v3332_v63 = vunpack.i.h.bf16 %v4429_v5 }
  0xce   :  { %3042 = vmatprep.subr.mxu1 %v566_v20  ;;  %3584 = vrot.lane.b32.xlu1 %v4169_v2, %s4178_s22 }
  0xcf   :  { %1328 = vrot.lane.b32.xlu0 %v4403_v61, %s4178_s22  ;;  %632 = vmatpush1.msra.mxu0 %v570_v22  ;;  %v545_v59 = vsel %vm530_vm7, %v3326_v50, %v3327_v49  ;;  %v4596_v22 = vpop.permute.xlu0 %3454  ;;  %v542_v27 = vsel %vm530_vm7, %v3316_v18, %v3317_v16  ;;  %v4700_v16 = vld [vmem:[%s5652_s1 + $0x18] sm:$0xff] }
  0xd0   :  { %3043 = vmatpush3.msra.mxu1 %v566_v20  ;;  %633 = vmatprep.subr.mxu0 %v568_v24  ;;  %v3331_v20 = vunpack.i.l.bf16 %v4429_v5  ;;  %v3322_v24 = vunpack.i.h.bf16 %v4421_v3  ;;  %v549_v5 = vsel %vm530_vm7, %v3341_v53, %v3342_v51 }
  0xd1   :  { %3044 = vmatprep.subr.mxu1 %v563_v25  ;;  %634 = vmatpush1.msra.mxu0 %v567_v26  ;;  %v547_v26 = vsel %vm530_vm7, %v3332_v63, %v3336_v43 }
  0xd2   :  { %3045 = vmatpush3.msra.mxu1 %v563_v25  ;;  %635 = vmatprep.subr.mxu0 %v565_v12  ;;  %v3321_v25 = vunpack.i.l.bf16 %v4421_v3  ;;  %v3312_v12 = vunpack.i.h.bf16 %v4405_v62  ;;  %v546_v3 = vsel %vm530_vm7, %v3331_v20, %v3332_v63  ;;  %v544_v28 = vsel %vm530_vm7, %v3322_v24, %v3326_v50 }
  0xd3   :  { %3046 = vmatprep.subr.mxu1 %v560_v30  ;;  %1330 = vrot.lane.b32.xlu1 %v4401_v60, %s4178_s22  ;;  %v4619_v32 = vpop.permute.xlu0 %3464  ;;  %v3296_v50 = vunpack.i.l.bf16 %v4391_v56 }
  0xd4   :  { %1332 = vrot.lane.b32.xlu0 %v4419_v1, %s4178_s22  ;;  %636 = vmatpush1.msra.mxu0 %v564_v31  ;;  %v543_v62 = vsel %vm530_vm7, %v3321_v25, %v3322_v24  ;;  %v4617_v31 = vpop.permute.xlu1 %3459  ;;  %v541_v33 = vsel %vm530_vm7, %v3312_v12, %v3316_v18  ;;  %v540_v34 = vsel %vm530_vm7, %v3311_v57, %v3312_v12 }
  0xd5   :  { %3047 = vmatpush3.msra.mxu1 %v560_v30  ;;  %637 = vmatprep.subr.mxu0 %v562_v8  ;;  %v3301_v30 = vunpack.i.l.bf16 %v4397_v58  ;;  %v538_v58 = vsel %vm530_vm7, %v3302_v17, %v3306_v19 }
  0xd6   :  { %3048 = vmatprep.subr.mxu1 %v557_v36  ;;  %638 = vmatpush1.msra.mxu0 %v561_v10 }
  0xd7   :  { %3049 = vmatpush3.msra.mxu1 %v557_v36  ;;  %639 = vmatprep.subr.mxu0 %v559_v13  ;;  %v537_v10 = vsel %vm530_vm7, %v3301_v30, %v3302_v17  ;;  %v4633_v8 = vpop.permute.xlu0 %3474  ;;  %v224_v30 = vld [vmem:[#allocation2 + $0x8] sm:$0xff] }
  0xd8   :  { %3050 = vmatprep.subr.mxu1 %v554_v41  ;;  %3589 = vrot.lane.b32.xlu1 %v4169_v2, %s4178_s22  ;;  %v4631_v15 = vpop.permute.xlu1 %3469 }
  0xd9   :  { %3594 = vrot.lane.b32.xlu0 %v4169_v2, %s4178_s22  ;;  %640 = vmatpush1.msra.mxu0 %v558_v6  ;;  %v3297_v6 = vunpack.i.h.bf16 %v4391_v56 }
  0xda   :  { %3051 = vmatpush3.msra.mxu1 %v554_v41  ;;  %641 = vmatprep.subr.mxu0 %v556_v4 }
  0xdb   :  { %3052 = vmatprep.subr.mxu1 %v551_v46  ;;  %642 = vmatpush1.msra.mxu0 %v555_v52  ;;  %v4643_v37 = vpop.permute.xlu0 %3484 }
  0xdc   :  { %3053 = vmatpush3.msra.mxu1 %v551_v46  ;;  %643 = vmatprep.subr.mxu0 %v553_v9  ;;  %v4641_v36 = vpop.permute.xlu1 %3479 }
  0xdd   :  { %3054 = vmatprep.subr.mxu1 %v548_v54  ;;  %3599 = vrot.lane.b32.xlu1 %v4169_v2, %s4178_s22 }
  0xde   :  { %3604 = vrot.lane.b32.xlu0 %v4169_v2, %s4178_s22  ;;  %644 = vmatpush1.msra.mxu0 %v552_v7 }
  0xdf   :  { %3055 = vmatpush3.msra.mxu1 %v548_v54  ;;  %645 = vmatprep.subr.mxu0 %v550_v14  ;;  %v4653_v39 = vpop.permute.xlu0 %3494 }
  0xe0   :  { %3056 = vmatprep.subr.mxu1 %v545_v59  ;;  %646 = vmatpush1.msra.mxu0 %v549_v5  ;;  %v4651_v38 = vpop.permute.xlu1 %3489 }
  0xe1   :  { %3057 = vmatpush3.msra.mxu1 %v545_v59  ;;  %647 = vmatprep.subr.mxu0 %v547_v26 }
  0xe2   :  { %3058 = vmatprep.subr.mxu1 %v542_v27  ;;  %3609 = vrot.lane.b32.xlu1 %v4169_v2, %s4178_s22 }
  0xe3   :  { %3614 = vrot.lane.b32.xlu0 %v4169_v2, %s4178_s22  ;;  %648 = vmatpush1.msra.mxu0 %v546_v3  ;;  %v226_v3 = vld [vmem:[#allocation2 + $0x20] sm:$0xff] }
  0xe4   :  { %3059 = vmatpush3.msra.mxu1 %v542_v27  ;;  %649 = vmatprep.subr.mxu0 %v544_v28  ;;  %v4661_v40 = vpop.permute.xlu1 %3499 }
  0xe5   :  { %3060 = vmatprep.subr.mxu1 %v539_v29  ;;  %650 = vmatpush1.msra.mxu0 %v543_v62  ;;  %v225_v62 = vld [vmem:[#allocation2 + $0x10] sm:$0xff] }
  0xe6   :  { %3061 = vmatpush3.msra.mxu1 %v539_v29  ;;  %651 = vmatprep.subr.mxu0 %v541_v33 }
  0xe7   :  { %3619 = vrot.lane.b32.xlu1 %v4169_v2, %s4178_s22  ;;  %3624 = vrot.lane.b32.xlu0 %v4169_v2, %s4178_s22 }
  0xe8   :  { %652 = vmatpush1.msra.mxu0 %v540_v34  ;;  %v223_v34 = vld [vmem:[#allocation2] sm:$0xff] }
  0xe9   :  { %653 = vmatprep.subr.mxu0 %v538_v58 }
  0xea   :  { %654 = vmatpush1.msra.mxu0 %v537_v10 }
  0xeb   :  { %3629 = vrot.lane.b32.xlu1 %v4169_v2, %s4178_s22  ;;  %3634 = vrot.lane.b32.xlu0 %v4169_v2, %s4178_s22 }
  0xef   :  { %3639 = vrot.lane.b32.xlu1 %v4169_v2, %s4178_s22  ;;  %3644 = vrot.lane.b32.xlu0 %v4169_v2, %s4178_s22 }
  0xf3   :  { %3649 = vrot.lane.b32.xlu1 %v4169_v2, %s4178_s22  ;;  %3654 = vrot.lane.b32.xlu0 %v4169_v2, %s4178_s22 }
  0xf7   :  { %3659 = vrot.lane.b32.xlu1 %v4169_v2, %s4178_s22  ;;  %3664 = vrot.lane.b32.xlu0 %v4169_v2, %s4178_s22 }
  0xfb   :  { %3669 = vrot.lane.b32.xlu1 %v4169_v2, %s4178_s22  ;;  %3674 = vrot.lane.b32.xlu0 %v4169_v2, %s4178_s22  ;;  %v403_v13 = vpop.permute.xlu0 %402  ;;  %v405_v41 = vpop.permute.xlu1 %404 }
  0xfc   :  { %v531_v56 = vsel %vm530_vm7, %v403_v13, %v405_v41 }
  0xff   :  { %3679 = vrot.lane.b32.xlu1 %v4169_v2, %s4178_s22  ;;  %3684 = vrot.lane.b32.xlu0 %v4169_v2, %s4178_s22  ;;  %v407_v42 = vpop.permute.xlu0 %406 }
 0x100   :  { %v532_v52 = vsel %vm530_vm7, %v405_v41, %v407_v42  ;;  %v533_v9 = vsel %vm530_vm7, %v407_v42, %v3296_v50 }
 0x103   :  { %3689 = vrot.lane.b32.xlu1 %v4169_v2, %s4178_s22  ;;  %3694 = vrot.lane.b32.xlu0 %v4169_v2, %s4178_s22 }
 0x107   :  { %3699 = vrot.lane.b32.xlu1 %v4169_v2, %s4178_s22  ;;  %v413_v43 = vpop.permute.xlu1 %412  ;;  %v411_v44 = vpop.permute.xlu0 %410  ;;  %3704 = vrot.lane.b32.xlu0 %v4169_v2, %s4178_s22 }
 0x108   :  { %v534_v51 = vsel %vm530_vm7, %v411_v44, %v413_v43  ;;  %v4857_v44 = vld [vmem:[%s5652_s1 + $0x8] sm:$0xff] }
 0x10b   :  { %3709 = vrot.lane.b32.xlu1 %v4169_v2, %s4178_s22  ;;  %v4678_v45 = vpop.permute.xlu1 %934  ;;  %v415_v4 = vpop.permute.xlu0 %414  ;;  %3714 = vrot.lane.b32.xlu0 %v4169_v2, %s4178_s22 }
 0x10c   :  { %v535_v46 = vsel %vm530_vm7, %v413_v43, %v415_v4  ;;  %v536_v49 = vsel %vm530_vm7, %v415_v4, %v3297_v6 }
 0x10d   :  { %655 = vmatprep.subr.mxu0 %v535_v46  ;;  %3062 = vmatprep.subr.mxu1 %v536_v49 }
 0x10e   :  { %656 = vmatpush1.msra.mxu0 %v534_v51  ;;  %3063 = vmatpush3.msra.mxu1 %v536_v49 }
 0x10f   :  { %3719 = vrot.lane.b32.xlu1 %v4169_v2, %s4178_s22  ;;  %v4689_v53 = vpop.permute.xlu1 %938  ;;  %657 = vmatprep.subr.mxu0 %v532_v52  ;;  %v4692_v54 = vpop.permute.xlu0 %936 }
 0x110   :  { %3724 = vrot.lane.b32.xlu0 %v4169_v2, %s4178_s22  ;;  %3064 = vmatprep.subr.mxu1 %v533_v9 }
 0x111   :  { %658 = vmatpush1.msra.mxu0 %v531_v56  ;;  %3065 = vmatpush3.msra.mxu1 %v533_v9 }
 0x112   :  { %779 = vmatprep.subr.mxu0 %v4169_v2  ;;  %3069 = vmatprep.subr.mxu1 %v4169_v2 }
 0x113   :  { %1706 = vrot.lane.b32.xlu1 %v4373_v48, %s4179_s25  ;;  %692 = vmatmul.mubr.f32.vlgmr.msra.gmra.mxu0 %v4416_v0  ;;  %v4707_v18 = vpop.permute.xlu1 %942  ;;  %v4709_v63 = vpop.permute.xlu0 %944 }
 0x114   :  { %1708 = vrot.lane.b32.xlu0 %v4371_v47, %s4179_s25  ;;  %3067 = vmatmul.mubr.f32.vlgmr.msra.gmra.mxu1 %v4700_v16  ;;  %v4728_v47 = vld [vmem:[#allocation2 + $0x18] sm:$0xff] }
 0x115   :  { %780 = vmatpush1.msra.mxu0 %v4169_v2  ;;  %3070 = vmatpush3.msra.mxu1 %v4169_v2 }
 0x116   :  { %781 = vmatprep.subr.mxu0 %v4169_v2  ;;  %3071 = vmatprep.subr.mxu1 %v4169_v2 }
 0x117   :  { %1710 = vrot.lane.b32.xlu1 %v4385_v55, %s4179_s25  ;;  %782 = vmatpush1.msra.mxu0 %v4169_v2  ;;  %v4721_v48 = vpop.permute.xlu1 %946  ;;  %v4723_v0 = vpop.permute.xlu0 %3504 }
 0x118   :  { %3729 = vrot.lane.b32.xlu0 %v4169_v2, %s4179_s25  ;;  %3072 = vmatpush3.msra.mxu1 %v4169_v2 }
 0x119   :  { %783 = vmatprep.subr.mxu0 %v4728_v47  ;;  %3073 = vmatprep.subr.mxu1 %v4728_v47 }
 0x11a   :  { %784 = vmatpush1.msra.mxu0 %v4728_v47  ;;  %3074 = vmatpush3.msra.mxu1 %v4728_v47 }
 0x11b   :  { %1714 = vrot.lane.b32.xlu1 %v4403_v61, %s4179_s25  ;;  %785 = vmatprep.subr.mxu0 %v4728_v47  ;;  %v4737_v55 = vpop.permute.xlu1 %3509  ;;  %v4739_v7 = vpop.permute.xlu0 %3514 }
 0x11c   :  { %1716 = vrot.lane.b32.xlu0 %v4401_v60, %s4179_s25  ;;  %3075 = vmatprep.subr.mxu1 %v4728_v47 }
 0x11d   :  { %786 = vmatpush1.msra.mxu0 %v4728_v47  ;;  %3076 = vmatpush3.msra.mxu1 %v4728_v47 }
 0x11e   :  { %787 = vmatprep.subr.mxu0 %v4728_v47  ;;  %3077 = vmatprep.subr.mxu1 %v4728_v47 }
 0x11f   :  { %1718 = vrot.lane.b32.xlu1 %v4419_v1, %s4179_s25  ;;  %788 = vmatpush1.msra.mxu0 %v4728_v47  ;;  %v4751_v61 = vpop.permute.xlu1 %3519  ;;  %v4753_v20 = vpop.permute.xlu0 %3524 }
 0x120   :  { %3734 = vrot.lane.b32.xlu0 %v4169_v2, %s4179_s25  ;;  %3078 = vmatpush3.msra.mxu1 %v4728_v47 }
 0x121   :  { %789 = vmatprep.subr.mxu0 %v4728_v47  ;;  %3079 = vmatprep.subr.mxu1 %v4728_v47 }
 0x122   :  { %790 = vmatpush1.msra.mxu0 %v4728_v47  ;;  %3080 = vmatpush3.msra.mxu1 %v4728_v47 }
 0x123   :  { %3739 = vrot.lane.b32.xlu1 %v4169_v2, %s4179_s25  ;;  %791 = vmatprep.subr.mxu0 %v4728_v47  ;;  %v4765_v14 = vpop.permute.xlu1 %3529  ;;  %v4767_v59 = vpop.permute.xlu0 %3534 }
 0x124   :  { %3744 = vrot.lane.b32.xlu0 %v4169_v2, %s4179_s25  ;;  %3081 = vmatprep.subr.mxu1 %v4728_v47 }
 0x125   :  { %792 = vmatpush1.msra.mxu0 %v4728_v47  ;;  %3082 = vmatpush3.msra.mxu1 %v4728_v47 }
 0x126   :  { %793 = vmatprep.subr.mxu0 %v4728_v47  ;;  %3083 = vmatprep.subr.mxu1 %v4728_v47 }
 0x127   :  { %794 = vmatpush1.msra.mxu0 %v4728_v47  ;;  %3084 = vmatpush3.msra.mxu1 %v4728_v47  ;;  %v4778_v23 = vpop.permute.xlu1 %3539  ;;  %v4780_v19 = vpop.permute.xlu0 %3544 }
 0x128   :  { %3749 = vrot.lane.b32.xlu1 %v4169_v2, %s4179_s25  ;;  %3754 = vrot.lane.b32.xlu0 %v4169_v2, %s4179_s25 }
 0x129   :  { %795 = vmatprep.subr.mxu0 %v4728_v47  ;;  %3085 = vmatprep.subr.mxu1 %v4728_v47 }
 0x12a   :  { %796 = vmatpush1.msra.mxu0 %v4728_v47  ;;  %3086 = vmatpush3.msra.mxu1 %v4728_v47 }
 0x12b   :  { %797 = vmatprep.subr.mxu0 %v4728_v47  ;;  %3087 = vmatprep.subr.mxu1 %v4728_v47  ;;  %v4792_v24 = vpop.permute.xlu1 %3549  ;;  %v4794_v5 = vpop.permute.xlu0 %3554 }
 0x12c   :  { %798 = vmatpush1.msra.mxu0 %v4728_v47  ;;  %3088 = vmatpush3.msra.mxu1 %v4728_v47  ;;  %v3552_v56 = vunpack.i.h.bf16 %v4792_v24 }
 0x12d   :  { %3759 = vrot.lane.b32.xlu1 %v4169_v2, %s4179_s25  ;;  %3764 = vrot.lane.b32.xlu0 %v4169_v2, %s4179_s25 }
 0x12e   :  { %799 = vmatprep.subr.mxu0 %v4728_v47  ;;  %3089 = vmatprep.subr.mxu1 %v4728_v47 }
 0x12f   :  { %800 = vmatpush1.msra.mxu0 %v4728_v47  ;;  %3090 = vmatpush3.msra.mxu1 %v4728_v47  ;;  %v4806_v25 = vpop.permute.xlu1 %3559  ;;  %v4808_v26 = vpop.permute.xlu0 %3564 }
 0x130   :  { %801 = vmatprep.subr.mxu0 %v4728_v47  ;;  %3091 = vmatprep.subr.mxu1 %v4728_v47  ;;  %v3562_v6 = vunpack.i.h.bf16 %v4806_v25  ;;  %v3561_v4 = vunpack.i.l.bf16 %v4806_v25  ;;  %v3567_v46 = vunpack.i.h.bf16 %v4808_v26  ;;  %v3566_v49 = vunpack.i.l.bf16 %v4808_v26 }
 0x131   :  { %802 = vmatpush1.msra.mxu0 %v4728_v47  ;;  %3092 = vmatpush3.msra.mxu1 %v4728_v47  ;;  %v3557_v25 = vunpack.i.h.bf16 %v4794_v5  ;;  %v3556_v26 = vunpack.i.l.bf16 %v4794_v5  ;;  %v3547_v5 = vunpack.i.h.bf16 %v4780_v19 }
 0x132   :  { %3769 = vrot.lane.b32.xlu1 %v4169_v2, %s4179_s25  ;;  %3774 = vrot.lane.b32.xlu0 %v4169_v2, %s4179_s25 }
 0x133   :  { %803 = vmatprep.subr.mxu0 %v4728_v47  ;;  %3093 = vmatprep.subr.mxu1 %v4728_v47  ;;  %v4820_v27 = vpop.permute.xlu1 %3569  ;;  %v3575_v12 = vpop.permute.xlu0 %3574 }
 0x134   :  { %804 = vmatpush1.msra.mxu0 %v4728_v47  ;;  %3094 = vmatpush3.msra.mxu1 %v4728_v47  ;;  %v3577_v33 = vunpack.i.h.bf16 %v3575_v12  ;;  %v3572_v41 = vunpack.i.h.bf16 %v4820_v27  ;;  %v3571_v42 = vunpack.i.l.bf16 %v4820_v27  ;;  %v3576_v43 = vunpack.i.l.bf16 %v3575_v12 }
 0x135   :  { %805 = vmatprep.subr.mxu0 %v4728_v47  ;;  %3095 = vmatprep.subr.mxu1 %v4728_v47  ;;  %v3542_v12 = vunpack.i.h.bf16 %v4778_v23 }
 0x136   :  { %806 = vmatpush1.msra.mxu0 %v4728_v47  ;;  %3096 = vmatpush3.msra.mxu1 %v4728_v47  ;;  %v1108_v52 = vsel %vm1062_vm8, %v3576_v43, %v3577_v33  ;;  %v1107_v9 = vsel %vm1062_vm8, %v3571_v42, %v3572_v41  ;;  %v1106_v27 = vsel %vm1062_vm8, %v3567_v46, %v3571_v42  ;;  %v3522_v43 = vunpack.i.h.bf16 %v4751_v61 }
 0x137   :  { %3779 = vrot.lane.b32.xlu1 %v4169_v2, %s4179_s25  ;;  %3784 = vrot.lane.b32.xlu0 %v4169_v2, %s4179_s25  ;;  %v3580_v57 = vpop.permute.xlu1 %3579 }
 0x138   :  { %807 = vmatprep.subr.mxu0 %v4401_v60  ;;  %3097 = vmatprep.subr.mxu1 %v4419_v1  ;;  %v3582_v17 = vunpack.i.h.bf16 %v3580_v57  ;;  %v3581_v28 = vunpack.i.l.bf16 %v3580_v57  ;;  %v4834_v29 = vpop.permute.xlu0 %1320  ;;  %v221_v60 = vld [vmem:[%s5652_s1] sm:$0xff]  ;;  %v1105_v57 = vsel %vm1062_vm8, %v3566_v49, %v3567_v46  ;;  %v3526_v46 = vunpack.i.l.bf16 %v4753_v20 }
 0x139   :  { %808 = vmatpush1.msra.mxu0 %v226_v3  ;;  %3098 = vmatpush3.msra.mxu1 %v4419_v1  ;;  %v3541_v3 = vunpack.i.l.bf16 %v4778_v23  ;;  %v1102_v23 = vsel %vm1062_vm8, %v3556_v26, %v3557_v25 }
 0x13a   :  { %809 = vmatprep.subr.mxu0 %v224_v30  ;;  %3099 = vmatprep.subr.mxu1 %v225_v62  ;;  %v1109_v58 = vsel %vm1062_vm8, %v3577_v33, %v3581_v28  ;;  %v1110_v13 = vsel %vm1062_vm8, %v3581_v28, %v3582_v17  ;;  %v3546_v17 = vunpack.i.l.bf16 %v4780_v19  ;;  %v1103_v28 = vsel %vm1062_vm8, %v3557_v25, %v3561_v4 }
 0x13b   :  { %810 = vmatpush1.msra.mxu0 %v223_v34  ;;  %3100 = vmatpush3.msra.mxu1 %v225_v62  ;;  %v4845_v1 = vpop.permute.xlu1 %1322  ;;  %v3532_v33 = vunpack.i.h.bf16 %v4765_v14  ;;  %v3531_v34 = vunpack.i.l.bf16 %v4765_v14  ;;  %v1098_v42 = vsel %vm1062_vm8, %v3541_v3, %v3542_v12 }
 0x13c   :  { %3789 = vrot.lane.b32.xlu1 %v4169_v2, %s4179_s25  ;;  %3794 = vrot.lane.b32.xlu0 %v4169_v2, %s4179_s25  ;;  %v4847_v10 = vpop.permute.xlu0 %1324  ;;  %v1099_v41 = vsel %vm1062_vm8, %v3546_v17, %v3547_v5  ;;  %v3497_v17 = vunpack.i.h.bf16 %v4653_v39 }
 0x13d   :  { %697 = vmatprep.mubr.f32.mxu0 %v4728_v47  ;;  %3101 = vmatprep.mubr.f32.mxu1 %v221_v60 }
 0x13e   :  { %698 = vmatmul.mubr.f32.gmra.mxu0 %v4700_v16  ;;  %1159 = vmatprep.subr.mxu0 %v1109_v58  ;;  %v3551_v16 = vunpack.i.l.bf16 %v4792_v24  ;;  %v1104_v24 = vsel %vm1062_vm8, %v3561_v4, %v3562_v6  ;;  %v3536_v58 = vunpack.i.l.bf16 %v4767_v59  ;;  %v3527_v4 = vunpack.i.h.bf16 %v4753_v20 }
 0x13f   :  { %843 = vmatprep.mubr.f32.mxu0 %v4728_v47  ;;  %3104 = vmatprep.subr.mxu1 %v1110_v13  ;;  %v3517_v20 = vunpack.i.h.bf16 %v4739_v7 }
 0x140   :  { %3799 = vrot.lane.b32.xlu1 %v4169_v2, %s4179_s25  ;;  %3804 = vrot.lane.b32.xlu0 %v4169_v2, %s4179_s25  ;;  %v4869_v50 = vpop.permute.xlu1 %3584  ;;  %v1101_v19 = vsel %vm1062_vm8, %v3551_v16, %v3552_v56  ;;  %v3511_v56 = vunpack.i.l.bf16 %v4737_v55  ;;  %v1094_v25 = vsel %vm1062_vm8, %v3527_v4, %v3531_v34  ;;  %v1093_v26 = vsel %vm1062_vm8, %v3526_v46, %v3527_v4 }
 0x141   :  { %3102 = vmatmul.mubr.f32.vlgmr.msra.gmra.mxu1 %v4857_v44  ;;  %v4871_v51 = vpop.permute.xlu0 %1328 }
 0x142   :  { %844 = vmatmul.mubr.f32.vlgmr.msra.gmra.mxu0 %v221_v60  ;;  %3105 = vmatpush3.msra.mxu1 %v1110_v13  ;;  %v3537_v60 = vunpack.i.h.bf16 %v4767_v59  ;;  %v1100_v13 = vsel %vm1062_vm8, %v3547_v5, %v3551_v16  ;;  %v3521_v59 = vunpack.i.l.bf16 %v4751_v61  ;;  %v1095_v61 = vsel %vm1062_vm8, %v3531_v34, %v3532_v33 }
 0x143   :  { %1160 = vmatpush1.msra.mxu0 %v1108_v52  ;;  %3106 = vmatprep.subr.mxu1 %v1107_v9  ;;  %v3512_v52 = vunpack.i.h.bf16 %v4737_v55  ;;  %v3516_v16 = vunpack.i.l.bf16 %v4739_v7  ;;  %v3502_v7 = vunpack.i.h.bf16 %v4661_v40  ;;  %v3501_v5 = vunpack.i.l.bf16 %v4661_v40 }
 0x144   :  { %3809 = vrot.lane.b32.xlu1 %v4169_v2, %s4179_s25  ;;  %3814 = vrot.lane.b32.xlu0 %v4169_v2, %s4179_s25  ;;  %v1097_v49 = vsel %vm1062_vm8, %v3537_v60, %v3541_v3  ;;  %v1092_v55 = vsel %vm1062_vm8, %v3521_v59, %v3522_v43  ;;  %v1091_v3 = vsel %vm1062_vm8, %v3517_v20, %v3521_v59  ;;  %v3492_v34 = vunpack.i.h.bf16 %v4651_v38 }
 0x145   :  { %1161 = vmatprep.subr.mxu0 %v1106_v27  ;;  %3107 = vmatpush3.msra.mxu1 %v1107_v9  ;;  %v4891_v30 = vpop.permute.xlu1 %1330  ;;  %v1096_v9 = vsel %vm1062_vm8, %v3536_v58, %v3537_v60  ;;  %v1089_v33 = vsel %vm1062_vm8, %v3511_v56, %v3512_v52  ;;  %v3486_v60 = vunpack.i.l.bf16 %v4643_v37  ;;  %v1086_v58 = vsel %vm1062_vm8, %v3501_v5, %v3502_v7 }
 0x146   :  { %1162 = vmatpush1.msra.mxu0 %v1105_v57  ;;  %3108 = vmatprep.subr.mxu1 %v1104_v24  ;;  %v4893_v62 = vpop.permute.xlu0 %1332  ;;  %v3507_v57 = vunpack.i.h.bf16 %v4723_v0  ;;  %v3477_v43 = vunpack.i.h.bf16 %v4633_v8  ;;  %v1085_v59 = vsel %vm1062_vm8, %v3497_v17, %v3501_v5  ;;  %v3467_v52 = vunpack.i.h.bf16 %v4619_v32 }
 0x147   :  { %1163 = vmatprep.subr.mxu0 %v1103_v28  ;;  %3109 = vmatpush3.msra.mxu1 %v1104_v24  ;;  %v3506_v24 = vunpack.i.l.bf16 %v4723_v0  ;;  %v1090_v28 = vsel %vm1062_vm8, %v3516_v16, %v3517_v20  ;;  %v3491_v0 = vunpack.i.l.bf16 %v4651_v38  ;;  %v3476_v38 = vunpack.i.l.bf16 %v4633_v8 }
 0x148   :  { %3819 = vrot.lane.b32.xlu1 %v4169_v2, %s4179_s25  ;;  %3824 = vrot.lane.b32.xlu0 %v4169_v2, %s4179_s25  ;;  %v1088_v40 = vsel %vm1062_vm8, %v3507_v57, %v3511_v56  ;;  %v3466_v56 = vunpack.i.l.bf16 %v4619_v32  ;;  %v3456_v32 = vunpack.i.l.bf16 %v4596_v22  ;;  %v3447_v5 = vunpack.i.h.bf16 %v4571_v11 }
 0x149   :  { %1164 = vmatpush1.msra.mxu0 %v1102_v23  ;;  %3110 = vmatprep.subr.mxu1 %v1101_v19  ;;  %v3496_v23 = vunpack.i.l.bf16 %v4653_v39  ;;  %v1087_v39 = vsel %vm1062_vm8, %v3506_v24, %v3507_v57  ;;  %v1083_v8 = vsel %vm1062_vm8, %v3491_v0, %v3492_v34  ;;  %v1078_v7 = vsel %vm1062_vm8, %v3476_v38, %v3477_v43 }
 0x14a   :  { %1165 = vmatprep.subr.mxu0 %v1100_v13  ;;  %3111 = vmatpush3.msra.mxu1 %v1101_v19  ;;  %v4909_v6 = vpop.permute.xlu1 %3589  ;;  %v3487_v19 = vunpack.i.h.bf16 %v4643_v37  ;;  %v3482_v37 = vunpack.i.h.bf16 %v4641_v36  ;;  %v3442_v34 = vunpack.i.h.bf16 %v4547_v35 }
 0x14b   :  { %1166 = vmatpush1.msra.mxu0 %v1099_v41  ;;  %3112 = vmatprep.subr.mxu1 %v1098_v42  ;;  %v4911_v14 = vpop.permute.xlu0 %3594  ;;  %v1084_v4 = vsel %vm1062_vm8, %v3496_v23, %v3497_v17 }
 0x14c   :  { %3829 = vrot.lane.b32.xlu1 %v4169_v2, %s4179_s25  ;;  %3834 = vrot.lane.b32.xlu0 %v4169_v2, %s4179_s25  ;;  %v1082_v46 = vsel %vm1062_vm8, %v3487_v19, %v3491_v0 }
 0x14d   :  { %1167 = vmatprep.subr.mxu0 %v1097_v49  ;;  %3113 = vmatpush3.msra.mxu1 %v1098_v42  ;;  %v3481_v42 = vunpack.i.l.bf16 %v4641_v36  ;;  %v3471_v49 = vunpack.i.l.bf16 %v4631_v15  ;;  %v1081_v36 = vsel %vm1062_vm8, %v3486_v60, %v3487_v19 }
 0x14e   :  { %1168 = vmatpush1.msra.mxu0 %v1096_v9  ;;  %3114 = vmatprep.subr.mxu1 %v1095_v61 }
 0x14f   :  { %1169 = vmatprep.subr.mxu0 %v1094_v25  ;;  %3115 = vmatpush3.msra.mxu1 %v1095_v61  ;;  %v4934_v27 = vpop.permute.xlu1 %3599  ;;  %v3472_v61 = vunpack.i.h.bf16 %v4631_v15  ;;  %v1079_v20 = vsel %vm1062_vm8, %v3477_v43, %v3481_v42  ;;  %v3461_v25 = vunpack.i.l.bf16 %v4617_v31  ;;  %v3462_v15 = vunpack.i.h.bf16 %v4617_v31 }
 0x150   :  { %3839 = vrot.lane.b32.xlu1 %v4169_v2, %s4179_s25  ;;  %3844 = vrot.lane.b32.xlu0 %v4169_v2, %s4179_s25  ;;  %v4936_v12 = vpop.permute.xlu0 %3604  ;;  %v1076_v57 = vsel %vm1062_vm8, %v3467_v52, %v3471_v49  ;;  %v1075_v31 = vsel %vm1062_vm8, %v3466_v56, %v3467_v52  ;;  %v1066_v43 = vsel %vm1062_vm8, %v4707_v18, %v4709_v63 }
 0x151   :  { %1170 = vmatpush1.msra.mxu0 %v1093_v26  ;;  %3116 = vmatprep.subr.mxu1 %v1092_v55  ;;  %v3457_v26 = vunpack.i.h.bf16 %v4596_v22  ;;  %v1077_v22 = vsel %vm1062_vm8, %v3471_v49, %v3472_v61  ;;  %v1074_v0 = vsel %vm1062_vm8, %v3461_v25, %v3462_v15  ;;  %v1063_v18 = vsel %vm1062_vm8, %v4678_v45, %v4692_v54  ;;  %v2899_v45 = vld [vmem:[%s5652_s1 + $0x28] sm:$0xff]  ;;  %v5073_v49 = vld [vmem:[%s5652_s1 + $0x30] sm:$0xff] }
 0x152   :  { %1171 = vmatprep.subr.mxu0 %v1091_v3  ;;  %3117 = vmatpush3.msra.mxu1 %v1092_v55  ;;  %v1080_v55 = vsel %vm1062_vm8, %v3481_v42, %v3482_v37  ;;  %v3451_v3 = vunpack.i.l.bf16 %v4594_v21  ;;  %v1068_v42 = vsel %vm1062_vm8, %v4721_v48, %v3442_v34  ;;  %v3441_v37 = vunpack.i.l.bf16 %v4547_v35 }
 0x153   :  { %1172 = vmatpush1.msra.mxu0 %v1090_v28  ;;  %3118 = vmatprep.subr.mxu1 %v1089_v33  ;;  %v3452_v28 = vunpack.i.h.bf16 %v4594_v21  ;;  %v1073_v23 = vsel %vm1062_vm8, %v3457_v26, %v3461_v25  ;;  %v1072_v19 = vsel %vm1062_vm8, %v3456_v32, %v3457_v26 }
 0x154   :  { %3849 = vrot.lane.b32.xlu1 %v4169_v2, %s4179_s25  ;;  %3854 = vrot.lane.b32.xlu0 %v4169_v2, %s4179_s25  ;;  %v4958_v13 = vpop.permute.xlu1 %3609  ;;  %v1065_v35 = vsel %vm1062_vm8, %v4689_v53, %v3441_v37 }
 0x155   :  { %1173 = vmatprep.subr.mxu0 %v1088_v40  ;;  %3119 = vmatpush3.msra.mxu1 %v1089_v33  ;;  %v4960_v41 = vpop.permute.xlu0 %3614  ;;  %v3446_v33 = vunpack.i.l.bf16 %v4571_v11  ;;  %v1070_v11 = vsel %vm1062_vm8, %v3447_v5, %v3451_v3  ;;  %v1071_v60 = vsel %vm1062_vm8, %v3451_v3, %v3452_v28 }
 0x156   :  { %1174 = vmatpush1.msra.mxu0 %v1087_v39  ;;  %3120 = vmatprep.subr.mxu1 %v1086_v58 }
 0x157   :  { %1175 = vmatprep.subr.mxu0 %v1085_v59  ;;  %3121 = vmatpush3.msra.mxu1 %v1086_v58  ;;  %v1069_v39 = vsel %vm1062_vm8, %v3446_v33, %v3447_v5  ;;  %v1067_v58 = vsel %vm1062_vm8, %v4709_v63, %v4721_v48  ;;  %v1064_v48 = vsel %vm1062_vm8, %v4692_v54, %v4689_v53 }
 0x158   :  { %1176 = vmatpush1.msra.mxu0 %v1084_v4  ;;  %3859 = vrot.lane.b32.xlu1 %v4169_v2, %s4179_s25  ;;  %v5040_v4 = vpack.i.bf16 %v4728_v47, %v4728_v47 }
 0x159   :  { %3864 = vrot.lane.b32.xlu0 %v4169_v2, %s4179_s25  ;;  %1177 = vmatprep.subr.mxu0 %v1082_v46  ;;  %v4977_v9 = vpop.permute.xlu1 %3619  ;;  %v4982_v16 = vpop.permute.xlu0 %3624 }
 0x15a   :  { %3122 = vmatprep.subr.mxu1 %v1083_v8  ;;  %1178 = vmatpush1.msra.mxu0 %v1081_v36 }
 0x15b   :  { %3123 = vmatpush3.msra.mxu1 %v1083_v8  ;;  %1179 = vmatprep.subr.mxu0 %v1079_v20 }
 0x15c   :  { %3124 = vmatprep.subr.mxu1 %v1080_v55  ;;  %1180 = vmatpush1.msra.mxu0 %v1078_v7 }
 0x15d   :  { %3125 = vmatpush3.msra.mxu1 %v1080_v55  ;;  %3869 = vrot.lane.b32.xlu1 %v4169_v2, %s4179_s25  ;;  %v4993_v24 = vpop.permute.xlu1 %3629  ;;  %v5001_v17 = vpop.permute.xlu0 %3634 }
 0x15e   :  { %3874 = vrot.lane.b32.xlu0 %v4169_v2, %s4180_s30  ;;  %1181 = vmatprep.subr.mxu0 %v1076_v57 }
 0x15f   :  { %3126 = vmatprep.subr.mxu1 %v1077_v22  ;;  %1182 = vmatpush1.msra.mxu0 %v1075_v31 }
 0x160   :  { %3127 = vmatpush3.msra.mxu1 %v1077_v22  ;;  %1183 = vmatprep.subr.mxu0 %v1073_v23 }
 0x161   :  { %3128 = vmatprep.subr.mxu1 %v1074_v0  ;;  %1184 = vmatpush1.msra.mxu0 %v1072_v19  ;;  %v5008_v40 = vpop.permute.xlu1 %3639  ;;  %v5013_v21 = vpop.permute.xlu0 %3644 }
 0x162   :  { %3129 = vmatpush3.msra.mxu1 %v1074_v0  ;;  %3879 = vrot.lane.b32.xlu1 %v4169_v2, %s4180_s30 }
 0x163   :  { %3884 = vrot.lane.b32.xlu0 %v4169_v2, %s4180_s30  ;;  %1185 = vmatprep.subr.mxu0 %v1070_v11 }
 0x164   :  { %3130 = vmatprep.subr.mxu1 %v1071_v60  ;;  %1186 = vmatpush1.msra.mxu0 %v1069_v39 }
 0x165   :  { %3131 = vmatpush3.msra.mxu1 %v1071_v60  ;;  %1187 = vmatprep.subr.mxu0 %v1067_v58  ;;  %v5028_v59 = vpop.permute.xlu1 %3649  ;;  %v5031_v38 = vpop.permute.xlu0 %3654 }
 0x166   :  { %3132 = vmatprep.subr.mxu1 %v1068_v42  ;;  %1188 = vmatpush1.msra.mxu0 %v1066_v43 }
 0x167   :  { %3133 = vmatpush3.msra.mxu1 %v1068_v42  ;;  %3889 = vrot.lane.b32.xlu1 %v4169_v2, %s4180_s30 }
 0x168   :  { %3894 = vrot.lane.b32.xlu0 %v4169_v2, %s4180_s30  ;;  %1189 = vmatprep.subr.mxu0 %v1064_v48  ;;  %v2898_v2 = vld [vmem:[%s5652_s1 + $0x20] sm:$0xff] }
 0x169   :  { %3134 = vmatprep.subr.mxu1 %v1065_v35  ;;  %1190 = vmatpush1.msra.mxu0 %v1063_v18  ;;  %v5049_v63 = vpop.permute.xlu1 %3659  ;;  %v5051_v46 = vpop.permute.xlu0 %3664 }
 0x16a   :  { %3135 = vmatpush3.msra.mxu1 %v1065_v35  ;;  %849 = vmatprep.mubr.f32.mxu0 %v4728_v47 }
 0x16b   :  { %3899 = vrot.lane.b32.xlu1 %v5040_v4, %s4180_s30  ;;  %850 = vmatmul.mubr.f32.gmra.mxu0 %v4857_v44 }
 0x16c   :  { %3904 = vrot.lane.b32.xlu0 %v5040_v4, %s4180_s30  ;;  %1223 = vmatprep.mubr.f32.mxu0 %v4728_v47 }
 0x16d   :  { %v5066_v53 = vpop.permute.xlu1 %3669  ;;  %3136 = vmatprep.mubr.f32.mxu1 %v2898_v2  ;;  %v5068_v54 = vpop.permute.xlu0 %3674 }
 0x16e   :  { %3137 = vmatmul.mubr.f32.vlgmr.msra.gmra.mxu1 %v2899_v45 }
 0x16f   :  { %3909 = vrot.lane.b32.xlu1 %v5040_v4, %s4180_s30  ;;  %1224 = vmatmul.mubr.f32.vlgmr.msra.gmra.mxu0 %v2898_v2 }
 0x170   :  { %3914 = vrot.lane.b32.xlu0 %v5040_v4, %s4180_s30  ;;  %1229 = vmatprep.mubr.f32.mxu0 %v4728_v47 }
 0x171   :  { %v5080_v44 = vpop.permute.xlu1 %3679  ;;  %3171 = vmatprep.mubr.f32.mxu1 %v5073_v49  ;;  %v5083_v52 = vpop.permute.xlu0 %3684 }
 0x173   :  { %3919 = vrot.lane.b32.xlu1 %v5040_v4, %s4180_s30  ;;  %1230 = vmatmul.mubr.f32.gmra.mxu0 %v2899_v45 }
 0x174   :  { %3924 = vrot.lane.b32.xlu0 %v5040_v4, %s4180_s30  ;;  %1609 = vmatprep.mubr.f32.mxu0 %v4728_v47 }
 0x175   :  { %v5090_v8 = vpop.permute.xlu1 %3689  ;;  %v5092_v36 = vpop.permute.xlu0 %3694 }
 0x176   :  { %v3692_v42 = vunpack.i.h.bf16 %v5090_v8  ;;  %v3697_v43 = vunpack.i.h.bf16 %v5092_v36  ;;  %v3696_v37 = vunpack.i.l.bf16 %v5092_v36  ;;  %v3691_v18 = vunpack.i.l.bf16 %v5090_v8 }
 0x177   :  { %3929 = vrot.lane.b32.xlu1 %v5040_v4, %s4180_s30 }
 0x178   :  { %3934 = vrot.lane.b32.xlu0 %v5040_v4, %s4180_s30 }
 0x179   :  { %v3700_v61 = vpop.permute.xlu1 %3699  ;;  %v3705_v56 = vpop.permute.xlu0 %3704 }
 0x17a   :  { %v3702_v0 = vunpack.i.h.bf16 %v3700_v61  ;;  %v3706_v19 = vunpack.i.l.bf16 %v3705_v56  ;;  %v3707_v34 = vunpack.i.h.bf16 %v3705_v56  ;;  %v3701_v60 = vunpack.i.l.bf16 %v3700_v61 }
 0x17b   :  { %3939 = vrot.lane.b32.xlu1 %v5040_v4, %s4180_s30  ;;  %v3682_v61 = vunpack.i.h.bf16 %v5080_v44  ;;  %v3687_v56 = vunpack.i.h.bf16 %v5083_v52 }
 0x17c   :  { %3944 = vrot.lane.b32.xlu0 %v5040_v4, %s4180_s30  ;;  %v1489_v45 = vsel %vm1448_vm9, %v3702_v0, %v3706_v19  ;;  %v1490_v36 = vsel %vm1448_vm9, %v3706_v19, %v3707_v34  ;;  %v1488_v8 = vsel %vm1448_vm9, %v3701_v60, %v3702_v0  ;;  %v3652_v34 = vunpack.i.h.bf16 %v5028_v59 }
 0x17d   :  { %v3710_v20 = vpop.permute.xlu1 %3709  ;;  %v3715_v47 = vpop.permute.xlu0 %3714  ;;  %v3657_v60 = vunpack.i.h.bf16 %v5031_v38 }
 0x17e   :  { %v3712_v57 = vunpack.i.h.bf16 %v3710_v20  ;;  %v3717_v3 = vunpack.i.h.bf16 %v3715_v47  ;;  %v3716_v5 = vunpack.i.l.bf16 %v3715_v47  ;;  %v3711_v31 = vunpack.i.l.bf16 %v3710_v20 }
 0x17f   :  { %3949 = vrot.lane.b32.xlu1 %v5040_v4, %s4180_s30  ;;  %v3686_v20 = vunpack.i.l.bf16 %v5083_v52  ;;  %v3681_v47 = vunpack.i.l.bf16 %v5080_v44  ;;  %v3676_v52 = vunpack.i.l.bf16 %v5068_v54  ;;  %v3677_v44 = vunpack.i.h.bf16 %v5068_v54 }
 0x180   :  { %3954 = vrot.lane.b32.xlu0 %v5040_v4, %s4180_s30  ;;  %v1492_v39 = vsel %vm1448_vm9, %v3712_v57, %v3716_v5  ;;  %v1493_v58 = vsel %vm1448_vm9, %v3716_v5, %v3717_v3  ;;  %v1491_v48 = vsel %vm1448_vm9, %v3711_v31, %v3712_v57  ;;  %v3671_v57 = vunpack.i.l.bf16 %v5066_v53 }
 0x181   :  { %v3720_v25 = vpop.permute.xlu1 %3719  ;;  %v1483_v3 = vsel %vm1448_vm9, %v3682_v61, %v3686_v20  ;;  %v1484_v5 = vsel %vm1448_vm9, %v3686_v20, %v3687_v56  ;;  %v3667_v31 = vunpack.i.h.bf16 %v5051_v46  ;;  %v3666_v54 = vunpack.i.l.bf16 %v5051_v46  ;;  %v5195_v56 = vld [vmem:[#allocation2 + $0x30] sm:$0xff] }
 0x182   :  { %v3722_v26 = vunpack.i.h.bf16 %v3720_v25  ;;  %v3721_v55 = vunpack.i.l.bf16 %v3720_v25  ;;  %v3725_v7 = vpop.permute.xlu0 %3724  ;;  %v1486_v25 = vsel %vm1448_vm9, %v3692_v42, %v3696_v37  ;;  %v1481_v46 = vsel %vm1448_vm9, %v3676_v52, %v3677_v44 }
 0x183   :  { %3959 = vrot.lane.b32.xlu1 %v5040_v4, %s4180_s30  ;;  %v3727_v15 = vunpack.i.h.bf16 %v3725_v7  ;;  %v3726_v32 = vunpack.i.l.bf16 %v3725_v7  ;;  %v3672_v7 = vunpack.i.h.bf16 %v5066_v53  ;;  %v3661_v53 = vunpack.i.l.bf16 %v5049_v63 }
 0x184   :  { %3964 = vrot.lane.b32.xlu0 %v5040_v4, %s4180_s30  ;;  %v1494_v22 = vsel %vm1448_vm9, %v3721_v55, %v3722_v26  ;;  %v3622_v44 = vunpack.i.h.bf16 %v4977_v9 }
 0x185   :  { %v5111_v28 = vpop.permute.xlu1 %1706  ;;  %v1495_v33 = vsel %vm1448_vm9, %v3722_v26, %v3726_v32  ;;  %v1496_v23 = vsel %vm1448_vm9, %v3726_v32, %v3727_v15  ;;  %v1487_v26 = vsel %vm1448_vm9, %v3696_v37, %v3697_v43  ;;  %v1485_v15 = vsel %vm1448_vm9, %v3691_v18, %v3692_v42 }
 0x186   :  { %v5115_v11 = vpop.permute.xlu0 %1708  ;;  %1545 = vmatprep.subr.mxu0 %v1495_v33  ;;  %3139 = vmatprep.subr.mxu1 %v1496_v23  ;;  %v1482_v33 = vsel %vm1448_vm9, %v3681_v47, %v3682_v61  ;;  %v1480_v0 = vsel %vm1448_vm9, %v3672_v7, %v3676_v52  ;;  %v1478_v43 = vsel %vm1448_vm9, %v3666_v54, %v3667_v31  ;;  %v3641_v61 = vunpack.i.l.bf16 %v5008_v40 }
 0x187   :  { %3969 = vrot.lane.b32.xlu1 %v5040_v4, %s4180_s30  ;;  %1546 = vmatpush1.msra.mxu0 %v1494_v22  ;;  %v3662_v22 = vunpack.i.h.bf16 %v5049_v63  ;;  %v1479_v63 = vsel %vm1448_vm9, %v3671_v57, %v3672_v7  ;;  %v3637_v47 = vunpack.i.h.bf16 %v5001_v17  ;;  %v3627_v57 = vunpack.i.h.bf16 %v4982_v16 }
 0x188   :  { %3974 = vrot.lane.b32.xlu0 %v5040_v4, %s4180_s30  ;;  %3140 = vmatpush3.msra.mxu1 %v1496_v23 }
 0x189   :  { %1547 = vmatprep.subr.mxu0 %v1492_v39  ;;  %3141 = vmatprep.subr.mxu1 %v1493_v58  ;;  %v5127_v35 = vpop.permute.xlu1 %1710  ;;  %v3656_v39 = vunpack.i.l.bf16 %v5031_v38  ;;  %v1477_v42 = vsel %vm1448_vm9, %v3662_v22, %v3666_v54  ;;  %v3646_v38 = vunpack.i.l.bf16 %v5013_v21  ;;  %v1476_v18 = vsel %vm1448_vm9, %v3661_v53, %v3662_v22 }
 0x18a   :  { %1548 = vmatpush1.msra.mxu0 %v1491_v48  ;;  %3142 = vmatpush3.msra.mxu1 %v1493_v58  ;;  %v5130_v2 = vpop.permute.xlu0 %3729  ;;  %v3651_v58 = vunpack.i.l.bf16 %v5028_v59  ;;  %v3642_v48 = vunpack.i.h.bf16 %v5008_v40  ;;  %v3647_v59 = vunpack.i.h.bf16 %v5013_v21  ;;  %v3632_v21 = vunpack.i.h.bf16 %v4993_v24 }
 0x18b   :  { %3979 = vrot.lane.b32.xlu1 %v5040_v4, %s4180_s30  ;;  %1549 = vmatprep.subr.mxu0 %v1489_v45  ;;  %v1474_v20 = vsel %vm1448_vm9, %v3652_v34, %v3656_v39  ;;  %v3621_v22 = vunpack.i.l.bf16 %v4977_v9 }
 0x18c   :  { %3984 = vrot.lane.b32.xlu0 %v5040_v4, %s4180_s30  ;;  %3143 = vmatprep.subr.mxu1 %v1490_v36  ;;  %v1473_v40 = vsel %vm1448_vm9, %v3651_v58, %v3652_v34  ;;  %v1471_v7 = vsel %vm1448_vm9, %v3642_v48, %v3646_v38  ;;  %v3602_v58 = vunpack.i.h.bf16 %v4934_v27 }
 0x18d   :  { %1550 = vmatpush1.msra.mxu0 %v1488_v8  ;;  %3144 = vmatpush3.msra.mxu1 %v1490_v36  ;;  %v5145_v55 = vpop.permute.xlu1 %1714  ;;  %v5190_v36 = vld [vmem:[#allocation2 + $0x28] sm:$0xff]  ;;  %v1475_v8 = vsel %vm1448_vm9, %v3656_v39, %v3657_v60  ;;  %v3611_v60 = vunpack.i.l.bf16 %v4958_v13  ;;  %v5238_v39 = vld [vmem:[#allocation2 + $0x10] sm:$0xff] }
 0x18e   :  { %1551 = vmatprep.subr.mxu0 %v1486_v25  ;;  %3145 = vmatprep.subr.mxu1 %v1487_v26  ;;  %v5150_v32 = vpop.permute.xlu0 %1716  ;;  %v3636_v25 = vunpack.i.l.bf16 %v5001_v17  ;;  %v1472_v17 = vsel %vm1448_vm9, %v3646_v38, %v3647_v59 }
 0x18f   :  { %3989 = vrot.lane.b32.xlu1 %v5040_v4, %s4180_s30  ;;  %1552 = vmatpush1.msra.mxu0 %v1485_v15 }
 0x190   :  { %3994 = vrot.lane.b32.xlu0 %v5040_v4, %s4180_s30  ;;  %3146 = vmatpush3.msra.mxu1 %v1487_v26  ;;  %v3631_v26 = vunpack.i.l.bf16 %v4993_v24  ;;  %v3626_v24 = vunpack.i.l.bf16 %v4982_v16  ;;  %v1468_v31 = vsel %vm1448_vm9, %v3632_v21, %v3636_v25  ;;  %v1469_v54 = vsel %vm1448_vm9, %v3636_v25, %v3637_v47 }
 0x191   :  { %1553 = vmatprep.subr.mxu0 %v1483_v3  ;;  %3147 = vmatprep.subr.mxu1 %v1484_v5  ;;  %v5164_v23 = vpop.permute.xlu1 %1718  ;;  %v5217_v3 = vld [vmem:[#allocation2 + $0x20] sm:$0xff]  ;;  %v3616_v16 = vunpack.i.l.bf16 %v4960_v41  ;;  %v3591_v47 = vunpack.i.l.bf16 %v4909_v6 }
 0x192   :  { %1554 = vmatpush1.msra.mxu0 %v1482_v33  ;;  %3148 = vmatpush3.msra.mxu1 %v1484_v5  ;;  %v5168_v19 = vpop.permute.xlu0 %3734  ;;  %v1470_v5 = vsel %vm1448_vm9, %v3641_v61, %v3642_v48  ;;  %v3612_v33 = vunpack.i.h.bf16 %v4958_v13  ;;  %v1467_v53 = vsel %vm1448_vm9, %v3631_v26, %v3632_v21  ;;  %v1464_v13 = vsel %vm1448_vm9, %v3621_v22, %v3622_v44 }
 0x193   :  { %3999 = vrot.lane.b32.xlu1 %v5040_v4, %s4180_s30  ;;  %1555 = vmatprep.subr.mxu0 %v1480_v0  ;;  %v3617_v0 = vunpack.i.h.bf16 %v4960_v41  ;;  %v1465_v41 = vsel %vm1448_vm9, %v3622_v44, %v3626_v24  ;;  %v3601_v48 = vunpack.i.l.bf16 %v4934_v27  ;;  %v3597_v61 = vunpack.i.h.bf16 %v4911_v14 }
 0x194   :  { %4004 = vrot.lane.b32.xlu0 %v5040_v4, %s4180_s30  ;;  %3149 = vmatprep.subr.mxu1 %v1481_v46  ;;  %v1462_v38 = vsel %vm1448_vm9, %v3612_v33, %v3616_v16  ;;  %v1461_v27 = vsel %vm1448_vm9, %v3611_v60, %v3612_v33  ;;  %v3587_v26 = vunpack.i.h.bf16 %v4869_v50  ;;  %v1453_v22 = vsel %vm1448_vm9, %v4891_v30, %v4893_v62 }
 0x195   :  { %1556 = vmatpush1.msra.mxu0 %v1479_v63  ;;  %3150 = vmatpush3.msra.mxu1 %v1481_v46  ;;  %v5182_v37 = vpop.permute.xlu1 %3739  ;;  %v5229_v46 = vld [vmem:[#allocation2 + $0x8] sm:$0xff]  ;;  %v1466_v63 = vsel %vm1448_vm9, %v3626_v24, %v3627_v57  ;;  %v1463_v59 = vsel %vm1448_vm9, %v3616_v16, %v3617_v0  ;;  %v1450_v33 = vsel %vm1448_vm9, %v4845_v1, %v4847_v10 }
 0x196   :  { %1557 = vmatprep.subr.mxu0 %v1477_v42  ;;  %3151 = vmatprep.subr.mxu1 %v1478_v43  ;;  %v5187_v45 = vpop.permute.xlu0 %3744  ;;  %v3607_v42 = vunpack.i.h.bf16 %v4936_v12 }
 0x197   :  { %2102 = vrot.lane.b32.xlu1 %v5190_v36, %s4180_s30  ;;  %1558 = vmatpush1.msra.mxu0 %v1476_v18  ;;  %v5250_v18 = vld [vmem:[#allocation2] sm:$0xff] }
 0x198   :  { %2104 = vrot.lane.b32.xlu0 %v5195_v56, %s4180_s30  ;;  %3152 = vmatpush3.msra.mxu1 %v1478_v43  ;;  %v3606_v43 = vunpack.i.l.bf16 %v4936_v12  ;;  %v3592_v12 = vunpack.i.h.bf16 %v4909_v6 }
 0x199   :  { %1559 = vmatprep.subr.mxu0 %v1474_v20  ;;  %3153 = vmatprep.subr.mxu1 %v1475_v8  ;;  %v3596_v20 = vunpack.i.l.bf16 %v4911_v14  ;;  %v1458_v14 = vsel %vm1448_vm9, %v3601_v48, %v3602_v58 }
 0x19a   :  { %1560 = vmatpush1.msra.mxu0 %v1473_v40  ;;  %3154 = vmatpush3.msra.mxu1 %v1475_v8  ;;  %v5207_v52 = vpop.permute.xlu1 %3749  ;;  %v5209_v15 = vpop.permute.xlu0 %3754  ;;  %v1459_v25 = vsel %vm1448_vm9, %v3602_v58, %v3606_v43  ;;  %v1460_v40 = vsel %vm1448_vm9, %v3606_v43, %v3607_v42  ;;  %v1455_v44 = vsel %vm1448_vm9, %v3591_v47, %v3592_v12 }
 0x19b   :  { %4009 = vrot.lane.b32.xlu1 %v5040_v4, %s4180_s30  ;;  %1561 = vmatprep.subr.mxu0 %v1471_v7  ;;  %v1456_v6 = vsel %vm1448_vm9, %v3592_v12, %v3596_v20  ;;  %v1457_v7 = vsel %vm1448_vm9, %v3596_v20, %v3597_v61  ;;  %v3757_v0 = vunpack.i.h.bf16 %v5209_v15 }
 0x19c   :  { %2100 = vrot.lane.b32.xlu0 %v5217_v3, %s4180_s30  ;;  %3155 = vmatprep.subr.mxu1 %v1472_v17 }
 0x19d   :  { %1562 = vmatpush1.msra.mxu0 %v1470_v5  ;;  %3156 = vmatpush3.msra.mxu1 %v1472_v17  ;;  %v3586_v17 = vunpack.i.l.bf16 %v4869_v50  ;;  %v1452_v50 = vsel %vm1448_vm9, %v4871_v51, %v4891_v30  ;;  %v1449_v30 = vsel %vm1448_vm9, %v4834_v29, %v4845_v1 }
 0x19e   :  { %1563 = vmatprep.subr.mxu0 %v1468_v31  ;;  %3157 = vmatprep.subr.mxu1 %v1469_v54  ;;  %v1454_v31 = vsel %vm1448_vm9, %v4893_v62, %v3587_v26 }
 0x19f   :  { %2094 = vrot.lane.b32.xlu1 %v5229_v46, %s4180_s30  ;;  %1564 = vmatpush1.msra.mxu0 %v1467_v53  ;;  %v5233_v9 = vpop.permute.xlu1 %3759  ;;  %v5235_v34 = vpop.permute.xlu0 %3764  ;;  %v1451_v51 = vsel %vm1448_vm9, %v4847_v10, %v3586_v17  ;;  %v5309_v53 = vld [vmem:[%s5652_s1 + $0x38] sm:$0xff] }
 0x1a0   :  { %2096 = vrot.lane.b32.xlu0 %v5238_v39, %s4180_s30  ;;  %3158 = vmatpush3.msra.mxu1 %v1469_v54  ;;  %v3761_v54 = vunpack.i.l.bf16 %v5233_v9  ;;  %v3762_v16 = vunpack.i.h.bf16 %v5233_v9  ;;  %v3767_v9 = vunpack.i.h.bf16 %v5235_v34  ;;  %v3766_v60 = vunpack.i.l.bf16 %v5235_v34 }
 0x1a1   :  { %1565 = vmatprep.subr.mxu0 %v1465_v41  ;;  %3159 = vmatprep.subr.mxu1 %v1466_v63 }
 0x1a2   :  { %1566 = vmatpush1.msra.mxu0 %v1464_v13  ;;  %3160 = vmatpush3.msra.mxu1 %v1466_v63  ;;  %v1881_v34 = vsel %vm1834_vm10, %v3757_v0, %v3761_v54  ;;  %v1880_v13 = vsel %vm1834_vm10, %v3762_v16, %v3757_v0 }
 0x1a3   :  { %2092 = vrot.lane.b32.xlu1 %v5250_v18, %s4180_s30  ;;  %1567 = vmatprep.subr.mxu0 %v1462_v38 }
 0x1a4   :  { %4014 = vrot.lane.b32.xlu0 %v5040_v4, %s4180_s30  ;;  %3161 = vmatprep.subr.mxu1 %v1463_v59  ;;  %v5261_v8 = vpop.permute.xlu1 %3769  ;;  %v5263_v21 = vpop.permute.xlu0 %3774 }
 0x1a5   :  { %1568 = vmatpush1.msra.mxu0 %v1461_v27  ;;  %3162 = vmatpush3.msra.mxu1 %v1463_v59  ;;  %v3777_v5 = vunpack.i.h.bf16 %v5263_v21  ;;  %v3771_v1 = vunpack.i.l.bf16 %v5261_v8  ;;  %v3772_v42 = vunpack.i.h.bf16 %v5261_v8  ;;  %v3776_v43 = vunpack.i.l.bf16 %v5263_v21 }
 0x1a6   :  { %1569 = vmatprep.subr.mxu0 %v1459_v25  ;;  %3163 = vmatprep.subr.mxu1 %v1460_v40 }
 0x1a7   :  { %1570 = vmatpush1.msra.mxu0 %v1458_v14  ;;  %3164 = vmatpush3.msra.mxu1 %v1460_v40  ;;  %v1882_v10 = vsel %vm1834_vm10, %v3761_v54, %v3777_v5  ;;  %v1877_v25 = vsel %vm1834_vm10, %v3771_v1, %v3766_v60  ;;  %v1875_v26 = vsel %vm1834_vm10, %v3772_v42, %v3776_v43 }
 0x1a8   :  { %4019 = vrot.lane.b32.xlu1 %v5040_v4, %s4181_s10  ;;  %4024 = vrot.lane.b32.xlu0 %v5040_v4, %s4181_s10 }
 0x1a9   :  { %1571 = vmatprep.subr.mxu0 %v1456_v6  ;;  %3165 = vmatprep.subr.mxu1 %v1457_v7  ;;  %v5278_v57 = vpop.permute.xlu1 %3779  ;;  %v5280_v24 = vpop.permute.xlu0 %3784 }
 0x1aa   :  { %1572 = vmatpush1.msra.mxu0 %v1455_v44  ;;  %3166 = vmatpush3.msra.mxu1 %v1457_v7  ;;  %v3787_v62 = vunpack.i.h.bf16 %v5280_v24  ;;  %v3781_v58 = vunpack.i.l.bf16 %v5278_v57  ;;  %v3782_v38 = vunpack.i.h.bf16 %v5278_v57  ;;  %v3786_v59 = vunpack.i.l.bf16 %v5280_v24 }
 0x1ab   :  { %1573 = vmatprep.subr.mxu0 %v1453_v22  ;;  %3167 = vmatprep.subr.mxu1 %v1454_v31 }
 0x1ac   :  { %1574 = vmatpush1.msra.mxu0 %v1452_v50  ;;  %3168 = vmatpush3.msra.mxu1 %v1454_v31  ;;  %v1879_v48 = vsel %vm1834_vm10, %v3767_v9, %v3787_v62  ;;  %v1874_v40 = vsel %vm1834_vm10, %v3781_v58, %v3772_v42  ;;  %v1872_v17 = vsel %vm1834_vm10, %v3782_v38, %v3786_v59 }
 0x1ad   :  { %4029 = vrot.lane.b32.xlu1 %v5040_v4, %s4181_s10  ;;  %4034 = vrot.lane.b32.xlu0 %v5040_v4, %s4181_s10 }
 0x1ae   :  { %1575 = vmatprep.subr.mxu0 %v1450_v33  ;;  %3169 = vmatprep.subr.mxu1 %v1451_v51  ;;  %v3790_v41 = vpop.permute.xlu1 %3789  ;;  %v5315_v63 = vpop.permute.xlu0 %3794 }
 0x1af   :  { %1576 = vmatpush1.msra.mxu0 %v1449_v30  ;;  %3170 = vmatpush3.msra.mxu1 %v1451_v51  ;;  %v3797_v29 = vunpack.i.h.bf16 %v5315_v63  ;;  %v3791_v12 = vunpack.i.l.bf16 %v3790_v41  ;;  %v3792_v27 = vunpack.i.h.bf16 %v3790_v41  ;;  %v3796_v8 = vunpack.i.l.bf16 %v5315_v63 }
 0x1b0   :  { %1610 = vmatmul.mubr.f32.vlgmr.msra.gmra.mxu0 %v5073_v49  ;;  %3172 = vmatmul.mubr.f32.vlgmr.msra.gmra.mxu1 %v5309_v53  ;;  %v1878_v49 = vsel %vm1834_vm10, %v3766_v60, %v3767_v9 }
 0x1b1   :  { %1931 = vmatprep.subr.mxu0 %v1881_v34  ;;  %3174 = vmatprep.subr.mxu1 %v1882_v10  ;;  %v1876_v47 = vsel %vm1834_vm10, %v3776_v43, %v3797_v29  ;;  %v1871_v44 = vsel %vm1834_vm10, %v3791_v12, %v3782_v38  ;;  %v1869_v5 = vsel %vm1834_vm10, %v3792_v27, %v3796_v8  ;;  %v5355_v29 = vld [vmem:[#allocation2 + $0x18] sm:$0xff] }
 0x1b2   :  { %1932 = vmatpush1.msra.mxu0 %v1880_v13  ;;  %3175 = vmatpush3.msra.mxu1 %v1882_v10  ;;  %v3800_v61 = vpop.permute.xlu1 %3799  ;;  %v3805_v20 = vpop.permute.xlu0 %3804 }
 0x1b3   :  { %4039 = vrot.lane.b32.xlu1 %v5040_v4, %s4181_s10  ;;  %4044 = vrot.lane.b32.xlu0 %v5040_v4, %s4181_s10  ;;  %v3807_v21 = vunpack.i.h.bf16 %v3805_v20  ;;  %v3801_v14 = vunpack.i.l.bf16 %v3800_v61  ;;  %v3802_v6 = vunpack.i.h.bf16 %v3800_v61  ;;  %v3806_v7 = vunpack.i.l.bf16 %v3805_v20 }
 0x1b4   :  { %1933 = vmatprep.subr.mxu0 %v1878_v49  ;;  %3176 = vmatprep.subr.mxu1 %v1879_v48 }
 0x1b5   :  { %1934 = vmatpush1.msra.mxu0 %v1877_v25  ;;  %3177 = vmatpush3.msra.mxu1 %v1879_v48  ;;  %v1873_v50 = vsel %vm1834_vm10, %v3786_v59, %v3807_v21  ;;  %v1868_v54 = vsel %vm1834_vm10, %v3801_v14, %v3792_v27  ;;  %v1866_v51 = vsel %vm1834_vm10, %v3802_v6, %v3806_v7 }
 0x1b6   :  { %1935 = vmatprep.subr.mxu0 %v1875_v26  ;;  %3178 = vmatprep.subr.mxu1 %v1876_v47  ;;  %v3810_v57 = vpop.permute.xlu1 %3809  ;;  %v3815_v24 = vpop.permute.xlu0 %3814 }
 0x1b7   :  { %1936 = vmatpush1.msra.mxu0 %v1874_v40  ;;  %4049 = vrot.lane.b32.xlu1 %v5040_v4, %s4181_s10  ;;  %v3811_v22 = vunpack.i.l.bf16 %v3810_v57  ;;  %v3817_v31 = vunpack.i.h.bf16 %v3815_v24  ;;  %v3812_v33 = vunpack.i.h.bf16 %v3810_v57  ;;  %v3816_v16 = vunpack.i.l.bf16 %v3815_v24 }
 0x1b8   :  { %4054 = vrot.lane.b32.xlu0 %v5040_v4, %s4181_s10  ;;  %1937 = vmatprep.subr.mxu0 %v1872_v17 }
 0x1b9   :  { %1938 = vmatpush1.msra.mxu0 %v1871_v44  ;;  %3179 = vmatpush3.msra.mxu1 %v1876_v47  ;;  %v1865_v0 = vsel %vm1834_vm10, %v3811_v22, %v3802_v6  ;;  %v1870_v9 = vsel %vm1834_vm10, %v3796_v8, %v3817_v31  ;;  %v1863_v1 = vsel %vm1834_vm10, %v3812_v33, %v3816_v16 }
 0x1ba   :  { %1939 = vmatprep.subr.mxu0 %v1869_v5  ;;  %3180 = vmatprep.subr.mxu1 %v1873_v50  ;;  %v3820_v30 = vpop.permute.xlu1 %3819  ;;  %v3825_v62 = vpop.permute.xlu0 %3824 }
 0x1bb   :  { %4059 = vrot.lane.b32.xlu1 %v5040_v4, %s4181_s10  ;;  %1940 = vmatpush1.msra.mxu0 %v1868_v54  ;;  %v3822_v60 = vunpack.i.h.bf16 %v3820_v30  ;;  %v3821_v10 = vunpack.i.l.bf16 %v3820_v30  ;;  %v3827_v41 = vunpack.i.h.bf16 %v3825_v62  ;;  %v3826_v63 = vunpack.i.l.bf16 %v3825_v62  ;;  %v5392_v62 = vld [vmem:[%s5652_s1 + $0x40] sm:$0xff] }
 0x1bc   :  { %4064 = vrot.lane.b32.xlu0 %v5040_v4, %s4181_s10  ;;  %1941 = vmatprep.subr.mxu0 %v1866_v51 }
 0x1bd   :  { %3181 = vmatpush3.msra.mxu1 %v1873_v50  ;;  %1615 = vmatprep.mubr.f32.mxu0 %v5355_v29  ;;  %v1862_v42 = vsel %vm1834_vm10, %v3821_v10, %v3812_v33  ;;  %v1867_v43 = vsel %vm1834_vm10, %v3806_v7, %v3827_v41  ;;  %v1860_v13 = vsel %vm1834_vm10, %v3822_v60, %v3826_v63  ;;  %v3746_v10 = vunpack.i.l.bf16 %v5187_v45 }
 0x1be   :  { %1942 = vmatpush1.msra.mxu0 %v1865_v0  ;;  %3182 = vmatprep.subr.mxu1 %v1870_v9  ;;  %v3830_v58 = vpop.permute.xlu1 %3829  ;;  %v3835_v34 = vpop.permute.xlu0 %3834  ;;  %v3747_v0 = vunpack.i.h.bf16 %v5187_v45  ;;  %v3756_v41 = vunpack.i.l.bf16 %v5209_v15  ;;  %v3737_v15 = vunpack.i.h.bf16 %v5168_v19 }
 0x1bf   :  { %4069 = vrot.lane.b32.xlu1 %v5040_v4, %s4181_s10  ;;  %1616 = vmatmul.mubr.f32.gmra.mxu0 %v5309_v53  ;;  %v3832_v48 = vunpack.i.h.bf16 %v3830_v58  ;;  %v3831_v38 = vunpack.i.l.bf16 %v3830_v58  ;;  %v3837_v59 = vunpack.i.h.bf16 %v3835_v34  ;;  %v3836_v49 = vunpack.i.l.bf16 %v3835_v34 }
 0x1c0   :  { %4074 = vrot.lane.b32.xlu0 %v5040_v4, %s4181_s10  ;;  %1943 = vmatprep.subr.mxu0 %v1863_v1  ;;  %v3741_v34 = vunpack.i.l.bf16 %v5182_v37 }
 0x1c1   :  { %3183 = vmatpush3.msra.mxu1 %v1870_v9  ;;  %1944 = vmatpush1.msra.mxu0 %v1862_v42  ;;  %v1859_v12 = vsel %vm1834_vm10, %v3831_v38, %v3822_v60  ;;  %v1864_v27 = vsel %vm1834_vm10, %v3816_v16, %v3837_v59  ;;  %v1857_v53 = vsel %vm1834_vm10, %v3832_v48, %v3836_v49  ;;  %v3751_v9 = vunpack.i.l.bf16 %v5207_v52 }
 0x1c2   :  { %3184 = vmatprep.subr.mxu1 %v1867_v43  ;;  %1945 = vmatprep.subr.mxu0 %v1860_v13  ;;  %v3840_v61 = vpop.permute.xlu1 %3839  ;;  %v3845_v20 = vpop.permute.xlu0 %3844  ;;  %v3736_v13 = vunpack.i.l.bf16 %v5168_v19  ;;  %v1844_v59 = vsel %vm1834_vm10, %v3746_v10, %v3747_v0 }
 0x1c3   :  { %4079 = vrot.lane.b32.xlu1 %v5040_v4, %s4181_s10  ;;  %3185 = vmatpush3.msra.mxu1 %v1867_v43  ;;  %v3842_v8 = vunpack.i.h.bf16 %v3840_v61  ;;  %v3841_v21 = vunpack.i.l.bf16 %v3840_v61  ;;  %v3847_v47 = vunpack.i.h.bf16 %v3845_v20  ;;  %v3846_v25 = vunpack.i.l.bf16 %v3845_v20 }
 0x1c4   :  { %4084 = vrot.lane.b32.xlu0 %v5040_v4, %s4181_s10  ;;  %1946 = vmatpush1.msra.mxu0 %v1859_v12  ;;  %v1845_v38 = vsel %vm1834_vm10, %v3747_v0, %v3751_v9  ;;  %v3752_v12 = vunpack.i.h.bf16 %v5207_v52  ;;  %v1842_v61 = vsel %vm1834_vm10, %v3737_v15, %v3741_v34  ;;  %v1839_v52 = vsel %vm1834_vm10, %v5150_v32, %v5164_v23 }
 0x1c5   :  { %3186 = vmatprep.subr.mxu1 %v1864_v27  ;;  %1947 = vmatprep.subr.mxu0 %v1857_v53  ;;  %v1856_v40 = vsel %vm1834_vm10, %v3841_v21, %v3832_v48  ;;  %v1861_v14 = vsel %vm1834_vm10, %v3826_v63, %v3847_v47  ;;  %v1854_v26 = vsel %vm1834_vm10, %v3842_v8, %v3846_v25 }
 0x1c6   :  { %3187 = vmatpush3.msra.mxu1 %v1864_v27  ;;  %v3850_v6 = vpop.permute.xlu1 %3849  ;;  %v3855_v7 = vpop.permute.xlu0 %3854  ;;  %1948 = vmatpush1.msra.mxu0 %v1856_v40  ;;  %v1841_v27 = vsel %vm1834_vm10, %v3736_v13, %v3737_v15  ;;  %v1838_v21 = vsel %vm1834_vm10, %v5145_v55, %v5150_v32  ;;  %v1846_v47 = vsel %vm1834_vm10, %v3751_v9, %v3752_v12  ;;  %v3732_v32 = vunpack.i.h.bf16 %v5130_v2 }
 0x1c7   :  { %4089 = vrot.lane.b32.xlu1 %v5040_v4, %s4181_s10  ;;  %v3852_v17 = vunpack.i.h.bf16 %v3850_v6  ;;  %v3851_v44 = vunpack.i.l.bf16 %v3850_v6  ;;  %v3857_v57 = vunpack.i.h.bf16 %v3855_v7  ;;  %v3856_v24 = vunpack.i.l.bf16 %v3855_v7  ;;  %3188 = vmatprep.subr.mxu1 %v1861_v14 }
 0x1c8   :  { %4094 = vrot.lane.b32.xlu0 %v5040_v4, %s4181_s10  ;;  %1949 = vmatprep.subr.mxu0 %v1854_v26  ;;  %v1835_v55 = vsel %vm1834_vm10, %v5111_v28, %v5115_v11 }
 0x1c9   :  { %3189 = vmatpush3.msra.mxu1 %v1861_v14  ;;  %v1853_v5 = vsel %vm1834_vm10, %v3851_v44, %v3842_v8  ;;  %v1858_v22 = vsel %vm1834_vm10, %v3836_v49, %v3857_v57  ;;  %v1851_v31 = vsel %vm1834_vm10, %v3852_v17, %v3856_v24  ;;  %1995 = vmatprep.mubr.f32.mxu0 %v5355_v29  ;;  %v3742_v8 = vunpack.i.h.bf16 %v5182_v37 }
 0x1ca   :  { %v3860_v50 = vpop.permute.xlu1 %3859  ;;  %1950 = vmatpush1.msra.mxu0 %v1853_v5  ;;  %3190 = vmatprep.subr.mxu1 %v1858_v22  ;;  %v1836_v37 = vsel %vm1834_vm10, %v5115_v11, %v5127_v35  ;;  %v3731_v57 = vunpack.i.l.bf16 %v5130_v2  ;;  %v1840_v5 = vsel %vm1834_vm10, %v5164_v23, %v3732_v32 }
 0x1cb   :  { %4099 = vrot.lane.b32.xlu1 %v5040_v4, %s4181_s10  ;;  %v3862_v54 = vunpack.i.h.bf16 %v3860_v50  ;;  %v3861_v33 = vunpack.i.l.bf16 %v3860_v50  ;;  %v3865_v16 = vpop.permute.xlu0 %3864  ;;  %1951 = vmatprep.subr.mxu0 %v1851_v31  ;;  %v1843_v7 = vsel %vm1834_vm10, %v3741_v34, %v3742_v8 }
 0x1cc   :  { %4104 = vrot.lane.b32.xlu0 %v5040_v4, %s4181_s10  ;;  %v3867_v51 = vunpack.i.h.bf16 %v3865_v16  ;;  %v3866_v30 = vunpack.i.l.bf16 %v3865_v16  ;;  %3191 = vmatpush3.msra.mxu1 %v1858_v22  ;;  %v4153_v16 = vpack.i.bf16 %v5355_v29, %v5355_v29 }
 0x1cd   :  { %v1850_v60 = vsel %vm1834_vm10, %v3861_v33, %v3852_v17  ;;  %3206 = vmatprep.mubr.f32.mxu1 %v5392_v62  ;;  %v1847_v45 = vsel %vm1834_vm10, %v3756_v41, %v3862_v54 }
 0x1ce   :  { %1952 = vmatpush1.msra.mxu0 %v1850_v60  ;;  %v1855_v63 = vsel %vm1834_vm10, %v3846_v25, %v3867_v51  ;;  %v1848_v1 = vsel %vm1834_vm10, %v3862_v54, %v3866_v30 }
 0x1cf   :  { %4109 = vrot.lane.b32.xlu1 %v5040_v4, %s4181_s10  ;;  %v3870_v58 = vpop.permute.xlu1 %3869  ;;  %3192 = vmatprep.subr.mxu1 %v1855_v63 }
 0x1d0   :  { %4114 = vrot.lane.b32.xlu0 %v5040_v4, %s4181_s10  ;;  %v3871_v42 = vunpack.i.l.bf16 %v3870_v58  ;;  %v5407_v43 = vpop.permute.xlu0 %3874  ;;  %1953 = vmatprep.subr.mxu0 %v1848_v1  ;;  %v3872_v48 = vunpack.i.h.bf16 %v3870_v58 }
 0x1d1   :  { %3193 = vmatpush3.msra.mxu1 %v1855_v63  ;;  %1954 = vmatpush1.msra.mxu0 %v1847_v45  ;;  %v3877_v25 = vunpack.i.h.bf16 %v5407_v43  ;;  %v3876_v40 = vunpack.i.l.bf16 %v5407_v43 }
 0x1d2   :  { %1955 = vmatprep.subr.mxu0 %v1845_v38  ;;  %v1852_v49 = vsel %vm1834_vm10, %v3856_v24, %v3871_v42  ;;  %v1849_v53 = vsel %vm1834_vm10, %v3866_v30, %v3872_v48 }
 0x1d3   :  { %4119 = vrot.lane.b32.xlu1 %v5040_v4, %s4181_s10  ;;  %1956 = vmatpush1.msra.mxu0 %v1844_v59  ;;  %v2267_v11 = vsel %vm2220_vm11, %v3876_v40, %v3877_v25 }
 0x1d4   :  { %4124 = vrot.lane.b32.xlu0 %v5040_v4, %s4181_s10  ;;  %v5420_v19 = vpop.permute.xlu1 %3879  ;;  %3194 = vmatprep.subr.mxu1 %v1852_v49 }
 0x1d5   :  { %v5423_v20 = vpop.permute.xlu0 %3884  ;;  %1957 = vmatprep.subr.mxu0 %v1842_v61  ;;  %3195 = vmatpush3.msra.mxu1 %v1852_v49  ;;  %v3881_v26 = vunpack.i.l.bf16 %v5420_v19  ;;  %v3882_v17 = vunpack.i.h.bf16 %v5420_v19 }
 0x1d6   :  { %1958 = vmatpush1.msra.mxu0 %v1841_v27  ;;  %3196 = vmatprep.subr.mxu1 %v1849_v53  ;;  %v3886_v44 = vunpack.i.l.bf16 %v5423_v20  ;;  %v3887_v28 = vunpack.i.h.bf16 %v5423_v20 }
 0x1d7   :  { %4129 = vrot.lane.b32.xlu1 %v5040_v4, %s4181_s10  ;;  %1959 = vmatprep.subr.mxu0 %v1839_v52  ;;  %v2266_v31 = vsel %vm2220_vm11, %v3881_v26, %v3876_v40 }
 0x1d8   :  { %4134 = vrot.lane.b32.xlu0 %v5040_v4, %s4181_s10  ;;  %3197 = vmatpush3.msra.mxu1 %v1849_v53  ;;  %v2264_v33 = vsel %vm2220_vm11, %v3882_v17, %v3886_v44 }
 0x1d9   :  { %v5441_v14 = vpop.permute.xlu1 %3889  ;;  %1960 = vmatpush1.msra.mxu0 %v1838_v21  ;;  %3198 = vmatprep.subr.mxu1 %v1846_v47 }
 0x1da   :  { %v3895_v6 = vpop.permute.xlu0 %3894  ;;  %1961 = vmatprep.subr.mxu0 %v1836_v37  ;;  %3199 = vmatpush3.msra.mxu1 %v1846_v47  ;;  %v3892_v2 = vunpack.i.h.bf16 %v5441_v14  ;;  %v3891_v50 = vunpack.i.l.bf16 %v5441_v14 }
 0x1db   :  { %4139 = vrot.lane.b32.xlu1 %v5040_v4, %s4181_s10  ;;  %1962 = vmatpush1.msra.mxu0 %v1835_v55  ;;  %v3897_v51 = vunpack.i.h.bf16 %v3895_v6  ;;  %v3896_v30 = vunpack.i.l.bf16 %v3895_v6 }
 0x1dc   :  { %4144 = vrot.lane.b32.xlu0 %v5040_v4, %s4181_s10  ;;  %3200 = vmatprep.subr.mxu1 %v1843_v7  ;;  %v2261_v10 = vsel %vm2220_vm11, %v3891_v50, %v3892_v2 }
 0x1dd   :  { %1996 = vmatmul.mubr.f32.vlgmr.msra.gmra.mxu0 %v5392_v62  ;;  %3201 = vmatpush3.msra.mxu1 %v1843_v7  ;;  %v5464_v24 = vpop.permute.xlu1 %3899  ;;  %v2263_v62 = vsel %vm2220_vm11, %v3887_v28, %v3882_v17  ;;  %v2260_v42 = vsel %vm2220_vm11, %v3897_v51, %v3891_v50 }
 0x1de   :  { %2317 = vmatprep.subr.mxu0 %v2267_v11  ;;  %v3905_v22 = vpop.permute.xlu0 %3904  ;;  %3202 = vmatprep.subr.mxu1 %v1840_v5  ;;  %v3902_v54 = vunpack.i.h.bf16 %v5464_v24  ;;  %v3901_v23 = vunpack.i.l.bf16 %v5464_v24 }
 0x1df   :  { %4149 = vrot.lane.b32.xlu1 %v5040_v4, %s4181_s10  ;;  %2318 = vmatpush1.msra.mxu0 %v2266_v31  ;;  %v2903_v4 = vld [vmem:[%s5652_s1 + $0x48] sm:$0xff]  ;;  %v3907_v60 = vunpack.i.h.bf16 %v3905_v22  ;;  %v3906_v1 = vunpack.i.l.bf16 %v3905_v22  ;;  %v5535_v31 = vld [vmem:[%s5652_s1 + $0x50] sm:$0xff] }
 0x1e0   :  { %2488 = vrot.lane.b32.xlu0 %v5190_v36, %s4181_s10  ;;  %3203 = vmatpush3.msra.mxu1 %v1840_v5  ;;  %v1837_v36 = vsel %vm1834_vm10, %v5127_v35, %v3731_v57  ;;  %v2258_v34 = vsel %vm2220_vm11, %v3901_v23, %v3902_v54 }
 0x1e1   :  { %2319 = vmatprep.subr.mxu0 %v2264_v33  ;;  %2001 = vmatprep.mubr.f32.mxu0 %v5355_v29  ;;  %v3910_v0 = vpop.permute.xlu1 %3909  ;;  %v2257_v38 = vsel %vm2220_vm11, %v3907_v60, %v3901_v23  ;;  %v2265_v43 = vsel %vm2220_vm11, %v3886_v44, %v3906_v1 }
 0x1e2   :  { %3204 = vmatprep.subr.mxu1 %v1837_v36  ;;  %2320 = vmatpush1.msra.mxu0 %v2263_v62  ;;  %v3915_v9 = vpop.permute.xlu0 %3914  ;;  %v3912_v41 = vunpack.i.h.bf16 %v3910_v0  ;;  %v3911_v63 = vunpack.i.l.bf16 %v3910_v0 }
 0x1e3   :  { %2490 = vrot.lane.b32.xlu1 %v5195_v56, %s4181_s10  ;;  %2002 = vmatmul.mubr.f32.gmra.mxu0 %v2903_v4  ;;  %v3917_v35 = vunpack.i.h.bf16 %v3915_v9  ;;  %v3916_v58 = vunpack.i.l.bf16 %v3915_v9  ;;  %v2268_v56 = vsel %vm2220_vm11, %v3877_v25, %v3896_v30 }
 0x1e4   :  { %4154 = vrot.lane.b32.xlu0 %v4153_v16, %s4181_s10  ;;  %3205 = vmatpush3.msra.mxu1 %v1837_v36  ;;  %v2255_v12 = vsel %vm2220_vm11, %v3911_v63, %v3912_v41 }
 0x1e5   :  { %2321 = vmatprep.subr.mxu0 %v2261_v10  ;;  %3207 = vmatmul.mubr.f32.vlgmr.msra.gmra.mxu1 %v2903_v4  ;;  %v3920_v45 = vpop.permute.xlu1 %3919  ;;  %v2262_v19 = vsel %vm2220_vm11, %v3892_v2, %v3916_v58  ;;  %v2254_v61 = vsel %vm2220_vm11, %v3917_v35, %v3911_v63 }
 0x1e6   :  { %2322 = vmatpush1.msra.mxu0 %v2260_v42  ;;  %3209 = vmatprep.subr.mxu1 %v2268_v56  ;;  %v3922_v15 = vunpack.i.h.bf16 %v3920_v45  ;;  %v3921_v13 = vunpack.i.l.bf16 %v3920_v45  ;;  %v3925_v48 = vpop.permute.xlu0 %3924 }
 0x1e7   :  { %2323 = vmatprep.subr.mxu0 %v2258_v34  ;;  %3210 = vmatpush3.msra.mxu1 %v2268_v56  ;;  %v3927_v59 = vunpack.i.h.bf16 %v3925_v48  ;;  %v3926_v49 = vunpack.i.l.bf16 %v3925_v48 }
 0x1e8   :  { %2486 = vrot.lane.b32.xlu1 %v5217_v3, %s4181_s10  ;;  %2480 = vrot.lane.b32.xlu0 %v5229_v46, %s4181_s10  ;;  %v2252_v3 = vsel %vm2220_vm11, %v3921_v13, %v3922_v15 }
 0x1e9   :  { %2324 = vmatpush1.msra.mxu0 %v2257_v38  ;;  %3211 = vmatprep.subr.mxu1 %v2265_v43  ;;  %v3930_v27 = vpop.permute.xlu1 %3929  ;;  %v2259_v21 = vsel %vm2220_vm11, %v3902_v54, %v3926_v49  ;;  %v2251_v47 = vsel %vm2220_vm11, %v3927_v59, %v3921_v13 }
 0x1ea   :  { %3212 = vmatpush3.msra.mxu1 %v2265_v43  ;;  %2325 = vmatprep.subr.mxu0 %v2255_v12  ;;  %v3932_v53 = vunpack.i.h.bf16 %v3930_v27  ;;  %v3931_v52 = vunpack.i.l.bf16 %v3930_v27  ;;  %v3935_v8 = vpop.permute.xlu0 %3934 }
 0x1eb   :  { %3213 = vmatprep.subr.mxu1 %v2262_v19  ;;  %2326 = vmatpush1.msra.mxu0 %v2254_v61  ;;  %v3937_v46 = vunpack.i.h.bf16 %v3935_v8  ;;  %v3936_v20 = vunpack.i.l.bf16 %v3935_v8 }
 0x1ec   :  { %3214 = vmatpush3.msra.mxu1 %v2262_v19  ;;  %2482 = vrot.lane.b32.xlu1 %v5238_v39, %s4181_s10  ;;  %v2249_v25 = vsel %vm2220_vm11, %v3931_v52, %v3932_v53 }
 0x1ed   :  { %2478 = vrot.lane.b32.xlu0 %v5250_v18, %s4181_s10  ;;  %2327 = vmatprep.subr.mxu0 %v2252_v3  ;;  %v3940_v40 = vpop.permute.xlu1 %3939  ;;  %v2256_v14 = vsel %vm2220_vm11, %v3912_v41, %v3936_v20  ;;  %v2248_v55 = vsel %vm2220_vm11, %v3937_v46, %v3931_v52 }
 0x1ee   :  { %3215 = vmatprep.subr.mxu1 %v2259_v21  ;;  %2328 = vmatpush1.msra.mxu0 %v2251_v47  ;;  %v3942_v37 = vunpack.i.h.bf16 %v3940_v40  ;;  %v3941_v26 = vunpack.i.l.bf16 %v3940_v40  ;;  %v3945_v6 = vpop.permute.xlu0 %3944 }
 0x1ef   :  { %3216 = vmatpush3.msra.mxu1 %v2259_v21  ;;  %v3947_v32 = vunpack.i.h.bf16 %v3945_v6  ;;  %v3946_v7 = vunpack.i.l.bf16 %v3945_v6  ;;  %2329 = vmatprep.subr.mxu0 %v2249_v25 }
 0x1f0   :  { %2492 = vrot.lane.b32.xlu1 %v5355_v29, %s4181_s10  ;;  %3217 = vmatprep.subr.mxu1 %v2256_v14  ;;  %v2246_v39 = vsel %vm2220_vm11, %v3941_v26, %v3942_v37 }
 0x1f1   :  { %2484 = vrot.lane.b32.xlu0 %v5355_v29, %s4181_s10  ;;  %2330 = vmatpush1.msra.mxu0 %v2248_v55  ;;  %v3950_v18 = vpop.permute.xlu1 %3949  ;;  %v2253_v17 = vsel %vm2220_vm11, %v3922_v15, %v3946_v7  ;;  %v2245_v44 = vsel %vm2220_vm11, %v3947_v32, %v3941_v26 }
 0x1f2   :  { %3218 = vmatpush3.msra.mxu1 %v2256_v14  ;;  %v3952_v57 = vunpack.i.h.bf16 %v3950_v18  ;;  %v3951_v28 = vunpack.i.l.bf16 %v3950_v18  ;;  %v3955_v11 = vpop.permute.xlu0 %3954  ;;  %2331 = vmatprep.subr.mxu0 %v2246_v39 }
 0x1f3   :  { %v3957_v24 = vunpack.i.h.bf16 %v3955_v11  ;;  %v3956_v5 = vunpack.i.l.bf16 %v3955_v11  ;;  %3219 = vmatprep.subr.mxu1 %v2253_v17  ;;  %2332 = vmatpush1.msra.mxu0 %v2245_v44 }
 0x1f4   :  { %3220 = vmatpush3.msra.mxu1 %v2253_v17  ;;  %v2243_v22 = vsel %vm2220_vm11, %v3951_v28, %v3952_v57  ;;  %2381 = vmatprep.mubr.f32.mxu0 %v5355_v29 }
 0x1f5   :  { %v3960_v2 = vpop.permute.xlu1 %3959  ;;  %2333 = vmatprep.subr.mxu0 %v2243_v22  ;;  %v2250_v50 = vsel %vm2220_vm11, %v3932_v53, %v3956_v5  ;;  %v2242_v54 = vsel %vm2220_vm11, %v3957_v24, %v3951_v28  ;;  %3241 = vmatprep.mubr.f32.mxu1 %v5535_v31 }
 0x1f6   :  { %v3962_v23 = vunpack.i.h.bf16 %v3960_v2  ;;  %v3961_v33 = vunpack.i.l.bf16 %v3960_v2  ;;  %v3965_v16 = vpop.permute.xlu0 %3964  ;;  %3221 = vmatprep.subr.mxu1 %v2250_v50  ;;  %2334 = vmatpush1.msra.mxu0 %v2242_v54 }
 0x1f7   :  { %v3967_v4 = vunpack.i.h.bf16 %v3965_v16  ;;  %v3966_v51 = vunpack.i.l.bf16 %v3965_v16  ;;  %3222 = vmatpush3.msra.mxu1 %v2250_v50 }
 0x1f8   :  { %v2240_v30 = vsel %vm2220_vm11, %v3961_v33, %v3962_v23 }
 0x1f9   :  { %v3970_v36 = vpop.permute.xlu1 %3969  ;;  %2335 = vmatprep.subr.mxu0 %v2240_v30  ;;  %v2247_v62 = vsel %vm2220_vm11, %v3942_v37, %v3966_v51  ;;  %v2239_v0 = vsel %vm2220_vm11, %v3967_v4, %v3961_v33  ;;  %v2905_v33 = vld [vmem:[%s5652_s1 + $0x58] sm:$0xff] }
 0x1fa   :  { %v3972_v9 = vunpack.i.h.bf16 %v3970_v36  ;;  %v3971_v60 = vunpack.i.l.bf16 %v3970_v36  ;;  %v3975_v10 = vpop.permute.xlu0 %3974  ;;  %3223 = vmatprep.subr.mxu1 %v2247_v62  ;;  %2336 = vmatpush1.msra.mxu0 %v2239_v0 }
 0x1fb   :  { %v3977_v41 = vunpack.i.h.bf16 %v3975_v10  ;;  %v3976_v63 = vunpack.i.l.bf16 %v3975_v10  ;;  %3224 = vmatpush3.msra.mxu1 %v2247_v62 }
 0x1fc   :  { %v2237_v1 = vsel %vm2220_vm11, %v3971_v60, %v3972_v9 }
 0x1fd   :  { %v3980_v35 = vpop.permute.xlu1 %3979  ;;  %2337 = vmatprep.subr.mxu0 %v2237_v1  ;;  %v2244_v58 = vsel %vm2220_vm11, %v3952_v57, %v3976_v63  ;;  %v2236_v34 = vsel %vm2220_vm11, %v3977_v41, %v3971_v60 }
 0x1fe   :  { %v3982_v42 = vunpack.i.h.bf16 %v3980_v35  ;;  %v3981_v56 = vunpack.i.l.bf16 %v3980_v35  ;;  %v3985_v45 = vpop.permute.xlu0 %3984  ;;  %3225 = vmatprep.subr.mxu1 %v2244_v58  ;;  %2338 = vmatpush1.msra.mxu0 %v2236_v34 }
 0x1ff   :  { %v3987_v15 = vunpack.i.h.bf16 %v3985_v45  ;;  %v3986_v13 = vunpack.i.l.bf16 %v3985_v45  ;;  %3226 = vmatpush3.msra.mxu1 %v2244_v58 }
 0x200   :  { %v2234_v48 = vsel %vm2220_vm11, %v3981_v56, %v3982_v42 }
 0x201   :  { %v3990_v38 = vpop.permute.xlu1 %3989  ;;  %2339 = vmatprep.subr.mxu0 %v2234_v48  ;;  %v2241_v59 = vsel %vm2220_vm11, %v3962_v23, %v3986_v13  ;;  %v2233_v49 = vsel %vm2220_vm11, %v3987_v15, %v3981_v56 }
 0x202   :  { %v3992_v12 = vunpack.i.h.bf16 %v3990_v38  ;;  %v3991_v43 = vunpack.i.l.bf16 %v3990_v38  ;;  %v3995_v19 = vpop.permute.xlu0 %3994  ;;  %3227 = vmatprep.subr.mxu1 %v2241_v59  ;;  %2340 = vmatpush1.msra.mxu0 %v2233_v49 }
 0x203   :  { %v3997_v61 = vunpack.i.h.bf16 %v3995_v19  ;;  %v3996_v27 = vunpack.i.l.bf16 %v3995_v19  ;;  %3228 = vmatpush3.msra.mxu1 %v2241_v59 }
 0x204   :  { %v2231_v53 = vsel %vm2220_vm11, %v3991_v43, %v3992_v12 }
 0x205   :  { %v4000_v52 = vpop.permute.xlu1 %3999  ;;  %2341 = vmatprep.subr.mxu0 %v2231_v53  ;;  %v2238_v8 = vsel %vm2220_vm11, %v3972_v9, %v3996_v27  ;;  %v2230_v3 = vsel %vm2220_vm11, %v3997_v61, %v3991_v43  ;;  %v5574_v9 = vld [vmem:[%s5652_s1 + $0x60] sm:$0xff]  ;;  %v4182_v43 = vmov 0   ;;  %v2862_v27 = vld [vmem:[%s5653_s2 + $0x8] sm:$0xff] }
 0x206   :  { %v4002_v46 = vunpack.i.h.bf16 %v4000_v52  ;;  %v4001_v20 = vunpack.i.l.bf16 %v4000_v52  ;;  %v4005_v21 = vpop.permute.xlu0 %4004  ;;  %3229 = vmatprep.subr.mxu1 %v2238_v8  ;;  %2342 = vmatpush1.msra.mxu0 %v2230_v3  ;;  %v2861_v61 = vld [vmem:[%s5653_s2] sm:$0xff] }
 0x207   :  { %v4007_v47 = vunpack.i.h.bf16 %v4005_v21  ;;  %v4006_v25 = vunpack.i.l.bf16 %v4005_v21  ;;  %3230 = vmatpush3.msra.mxu1 %v2238_v8  ;;  %4158 = vset.pattern.permute.xlu1 %v4182_v43 }
 0x208   :  { %v2228_v40 = vsel %vm2220_vm11, %v4001_v20, %v4002_v46  ;;  %4159 = vset.pattern.permute.xlu0 %v4182_v43  ;;  %2865 = vperm.xlu1 %4158, %v2861_v61  }
 0x209   :  { %v2103_v14 = vpop.permute.xlu1 %2102  ;;  %2343 = vmatprep.subr.mxu0 %v2228_v40  ;;  %v2235_v37 = vsel %vm2220_vm11, %v3982_v42, %v4006_v25  ;;  %v2227_v26 = vsel %vm2220_vm11, %v4007_v47, %v4001_v20  ;;  %2870 = vperm.xlu0 %4159, %v2862_v27  }
 0x20a   :  { %v2105_v6 = vpop.permute.xlu0 %2104  ;;  %3231 = vmatprep.subr.mxu1 %v2235_v37  ;;  %2344 = vmatpush1.msra.mxu0 %v2227_v26 }
 0x20b   :  { %3232 = vmatpush3.msra.mxu1 %v2235_v37  ;;  %v2225_v55 = vsel %vm2220_vm11, %v2103_v14, %v2105_v6 }
 0x20c   :  { %2345 = vmatprep.subr.mxu0 %v2225_v55 }
 0x20d   :  { %v4010_v32 = vpop.permute.xlu1 %4009 }
 0x20e   :  { %v4012_v7 = vunpack.i.h.bf16 %v4010_v32  ;;  %v4011_v39 = vunpack.i.l.bf16 %v4010_v32  ;;  %v2101_v18 = vpop.permute.xlu0 %2100 }
 0x20f   :  { %v2224_v17 = vsel %vm2220_vm11, %v2101_v18, %v2103_v14 }
 0x210   :  { %2346 = vmatpush1.msra.mxu0 %v2224_v17  ;;  %v2232_v44 = vsel %vm2220_vm11, %v3992_v12, %v4011_v39  ;;  %v2229_v11 = vsel %vm2220_vm11, %v4002_v46, %v4012_v7 }
 0x211   :  { %v2095_v57 = vpop.permute.xlu1 %2094  ;;  %3233 = vmatprep.subr.mxu1 %v2232_v44 }
 0x212   :  { %v2097_v28 = vpop.permute.xlu0 %2096  ;;  %3234 = vmatpush3.msra.mxu1 %v2232_v44 }
 0x213   :  { %v2222_v24 = vsel %vm2220_vm11, %v2095_v57, %v2097_v28  ;;  %3235 = vmatprep.subr.mxu1 %v2229_v11 }
 0x214   :  { %2347 = vmatprep.subr.mxu0 %v2222_v24  ;;  %3236 = vmatpush3.msra.mxu1 %v2229_v11 }
 0x215   :  { %v2093_v5 = vpop.permute.xlu1 %2092 }
 0x216   :  { %v2221_v22 = vsel %vm2220_vm11, %v2093_v5, %v2095_v57  ;;  %v4015_v2 = vpop.permute.xlu0 %4014 }
 0x217   :  { %v4017_v50 = vunpack.i.h.bf16 %v4015_v2  ;;  %v4016_v54 = vunpack.i.l.bf16 %v4015_v2  ;;  %2348 = vmatpush1.msra.mxu0 %v2221_v22 }
 0x218   :  { %2382 = vmatmul.mubr.f32.vlgmr.msra.gmra.mxu0 %v5535_v31 }
 0x219   :  { %v2226_v23 = vsel %vm2220_vm11, %v2105_v6, %v4016_v54  ;;  %2387 = vmatprep.mubr.f32.mxu0 %v5355_v29  ;;  %v2223_v62 = vsel %vm2220_vm11, %v2097_v28, %v4017_v50 }
 0x21a   :  { %v4020_v16 = vpop.permute.xlu1 %4019  ;;  %v4025_v4 = vpop.permute.xlu0 %4024  ;;  %3237 = vmatprep.subr.mxu1 %v2226_v23 }
 0x21b   :  { %v4022_v51 = vunpack.i.h.bf16 %v4020_v16  ;;  %v4021_v30 = vunpack.i.l.bf16 %v4020_v16  ;;  %v4026_v36 = vunpack.i.l.bf16 %v4025_v4  ;;  %3238 = vmatpush3.msra.mxu1 %v2226_v23  ;;  %v4027_v60 = vunpack.i.h.bf16 %v4025_v4 }
 0x21c   :  { %3239 = vmatprep.subr.mxu1 %v2223_v62  ;;  %2388 = vmatmul.mubr.f32.gmra.mxu0 %v2905_v33 }
 0x21d   :  { %3240 = vmatpush3.msra.mxu1 %v2223_v62  ;;  %v2653_v31 = vsel %vm2606_vm12, %v4021_v30, %v4022_v51  ;;  %v2652_v0 = vsel %vm2606_vm12, %v4026_v36, %v4021_v30  ;;  %2767 = vmatprep.mubr.f32.mxu0 %v5355_v29 }
 0x21e   :  { %3242 = vmatmul.mubr.f32.vlgmr.msra.gmra.mxu1 %v2905_v33  ;;  %2703 = vmatprep.subr.mxu0 %v2653_v31 }
 0x21f   :  { %v4030_v10 = vpop.permute.xlu1 %4029  ;;  %v4035_v41 = vpop.permute.xlu0 %4034  ;;  %2704 = vmatpush1.msra.mxu0 %v2652_v0  ;;  %3276 = vmatprep.mubr.f32.mxu1 %v5574_v9 }
 0x220   :  { %v4032_v63 = vunpack.i.h.bf16 %v4030_v10  ;;  %v4031_v1 = vunpack.i.l.bf16 %v4030_v10  ;;  %v4037_v35 = vunpack.i.h.bf16 %v4035_v41  ;;  %v4036_v58 = vunpack.i.l.bf16 %v4035_v41 }
 0x222   :  { %v2650_v34 = vsel %vm2606_vm12, %v4027_v60, %v4031_v1  ;;  %v2649_v29 = vsel %vm2606_vm12, %v4032_v63, %v4027_v60  ;;  %v2647_v42 = vsel %vm2606_vm12, %v4036_v58, %v4037_v35 }
 0x223   :  { %2705 = vmatprep.subr.mxu0 %v2650_v34 }
 0x224   :  { %2706 = vmatpush1.msra.mxu0 %v2649_v29 }
 0x225   :  { %v4040_v56 = vpop.permute.xlu1 %4039  ;;  %v4045_v45 = vpop.permute.xlu0 %4044  ;;  %2707 = vmatprep.subr.mxu0 %v2647_v42 }
 0x226   :  { %v4042_v15 = vunpack.i.h.bf16 %v4040_v56  ;;  %v4041_v13 = vunpack.i.l.bf16 %v4040_v56  ;;  %v4047_v48 = vunpack.i.h.bf16 %v4045_v45  ;;  %v4046_v38 = vunpack.i.l.bf16 %v4045_v45 }
 0x228   :  { %v2646_v59 = vsel %vm2606_vm12, %v4042_v15, %v4036_v58  ;;  %v2654_v49 = vsel %vm2606_vm12, %v4022_v51, %v4041_v13  ;;  %v2644_v12 = vsel %vm2606_vm12, %v4046_v38, %v4047_v48 }
 0x229   :  { %v4050_v19 = vpop.permute.xlu1 %4049  ;;  %2708 = vmatpush1.msra.mxu0 %v2646_v59  ;;  %3244 = vmatprep.subr.mxu1 %v2654_v49 }
 0x22a   :  { %v4052_v53 = vunpack.i.h.bf16 %v4050_v19  ;;  %v4051_v52 = vunpack.i.l.bf16 %v4050_v19  ;;  %v4055_v8 = vpop.permute.xlu0 %4054  ;;  %3245 = vmatpush3.msra.mxu1 %v2654_v49  ;;  %2709 = vmatprep.subr.mxu0 %v2644_v12 }
 0x22b   :  { %v4057_v3 = vunpack.i.h.bf16 %v4055_v8  ;;  %v4056_v46 = vunpack.i.l.bf16 %v4055_v8 }
 0x22c   :  { %v2643_v20 = vsel %vm2606_vm12, %v4052_v53, %v4046_v38  ;;  %v2651_v21 = vsel %vm2606_vm12, %v4031_v1, %v4051_v52 }
 0x22d   :  { %v4060_v47 = vpop.permute.xlu1 %4059  ;;  %2710 = vmatpush1.msra.mxu0 %v2643_v20  ;;  %3246 = vmatprep.subr.mxu1 %v2651_v21  ;;  %v2641_v25 = vsel %vm2606_vm12, %v4056_v46, %v4057_v3 }
 0x22e   :  { %v4062_v40 = vunpack.i.h.bf16 %v4060_v47  ;;  %v4061_v14 = vunpack.i.l.bf16 %v4060_v47  ;;  %v4065_v37 = vpop.permute.xlu0 %4064  ;;  %3247 = vmatpush3.msra.mxu1 %v2651_v21  ;;  %2711 = vmatprep.subr.mxu0 %v2641_v25 }
 0x22f   :  { %v4067_v26 = vunpack.i.h.bf16 %v4065_v37  ;;  %v4066_v6 = vunpack.i.l.bf16 %v4065_v37 }
 0x230   :  { %v2640_v55 = vsel %vm2606_vm12, %v4062_v40, %v4056_v46  ;;  %v2648_v32 = vsel %vm2606_vm12, %v4037_v35, %v4061_v14 }
 0x231   :  { %v4070_v7 = vpop.permute.xlu1 %4069  ;;  %2712 = vmatpush1.msra.mxu0 %v2640_v55  ;;  %3248 = vmatprep.subr.mxu1 %v2648_v32  ;;  %v2638_v39 = vsel %vm2606_vm12, %v4066_v6, %v4067_v26 }
 0x232   :  { %v4072_v18 = vunpack.i.h.bf16 %v4070_v7  ;;  %v4071_v17 = vunpack.i.l.bf16 %v4070_v7  ;;  %v4075_v44 = vpop.permute.xlu0 %4074  ;;  %3249 = vmatpush3.msra.mxu1 %v2648_v32  ;;  %2713 = vmatprep.subr.mxu0 %v2638_v39 }
 0x233   :  { %v4077_v57 = vunpack.i.h.bf16 %v4075_v44  ;;  %v4076_v28 = vunpack.i.l.bf16 %v4075_v44 }
 0x234   :  { %v2637_v11 = vsel %vm2606_vm12, %v4072_v18, %v4066_v6  ;;  %v2645_v24 = vsel %vm2606_vm12, %v4047_v48, %v4071_v17 }
 0x235   :  { %v4080_v5 = vpop.permute.xlu1 %4079  ;;  %2714 = vmatpush1.msra.mxu0 %v2637_v11  ;;  %3250 = vmatprep.subr.mxu1 %v2645_v24  ;;  %v2635_v22 = vsel %vm2606_vm12, %v4076_v28, %v4077_v57 }
 0x236   :  { %v4082_v2 = vunpack.i.h.bf16 %v4080_v5  ;;  %v4081_v50 = vunpack.i.l.bf16 %v4080_v5  ;;  %v4085_v54 = vpop.permute.xlu0 %4084  ;;  %3251 = vmatpush3.msra.mxu1 %v2645_v24  ;;  %2715 = vmatprep.subr.mxu0 %v2635_v22 }
 0x237   :  { %v4087_v23 = vunpack.i.h.bf16 %v4085_v54  ;;  %v4086_v33 = vunpack.i.l.bf16 %v4085_v54 }
 0x238   :  { %v2634_v16 = vsel %vm2606_vm12, %v4082_v2, %v4076_v28  ;;  %v2642_v4 = vsel %vm2606_vm12, %v4057_v3, %v4081_v50 }
 0x239   :  { %v4090_v51 = vpop.permute.xlu1 %4089  ;;  %2716 = vmatpush1.msra.mxu0 %v2634_v16  ;;  %3252 = vmatprep.subr.mxu1 %v2642_v4  ;;  %v2632_v30 = vsel %vm2606_vm12, %v4086_v33, %v4087_v23 }
 0x23a   :  { %v4092_v36 = vunpack.i.h.bf16 %v4090_v51  ;;  %v4091_v62 = vunpack.i.l.bf16 %v4090_v51  ;;  %v4095_v31 = vpop.permute.xlu0 %4094  ;;  %3253 = vmatpush3.msra.mxu1 %v2642_v4  ;;  %2717 = vmatprep.subr.mxu0 %v2632_v30 }
 0x23b   :  { %v4097_v0 = vunpack.i.h.bf16 %v4095_v31  ;;  %v4096_v60 = vunpack.i.l.bf16 %v4095_v31 }
 0x23c   :  { %v2631_v10 = vsel %vm2606_vm12, %v4092_v36, %v4086_v33  ;;  %v2639_v41 = vsel %vm2606_vm12, %v4067_v26, %v4091_v62 }
 0x23d   :  { %v4100_v63 = vpop.permute.xlu1 %4099  ;;  %2718 = vmatpush1.msra.mxu0 %v2631_v10  ;;  %3254 = vmatprep.subr.mxu1 %v2639_v41  ;;  %v2629_v1 = vsel %vm2606_vm12, %v4096_v60, %v4097_v0 }
 0x23e   :  { %v4102_v35 = vunpack.i.h.bf16 %v4100_v63  ;;  %v4101_v58 = vunpack.i.l.bf16 %v4100_v63  ;;  %v4105_v34 = vpop.permute.xlu0 %4104  ;;  %3255 = vmatpush3.msra.mxu1 %v2639_v41  ;;  %2719 = vmatprep.subr.mxu0 %v2629_v1 }
 0x23f   :  { %v4107_v29 = vunpack.i.h.bf16 %v4105_v34  ;;  %v4106_v42 = vunpack.i.l.bf16 %v4105_v34 }
 0x240   :  { %v2628_v56 = vsel %vm2606_vm12, %v4102_v35, %v4096_v60  ;;  %v2636_v45 = vsel %vm2606_vm12, %v4077_v57, %v4101_v58 }
 0x241   :  { %v4110_v15 = vpop.permute.xlu1 %4109  ;;  %2720 = vmatpush1.msra.mxu0 %v2628_v56  ;;  %3256 = vmatprep.subr.mxu1 %v2636_v45  ;;  %v2626_v13 = vsel %vm2606_vm12, %v4106_v42, %v4107_v29  ;;  %v2907_v56 = vld [vmem:[%s5652_s1 + $0x68] sm:$0xff] }
 0x242   :  { %v4112_v48 = vunpack.i.h.bf16 %v4110_v15  ;;  %v4111_v38 = vunpack.i.l.bf16 %v4110_v15  ;;  %v4115_v59 = vpop.permute.xlu0 %4114  ;;  %3257 = vmatpush3.msra.mxu1 %v2636_v45  ;;  %2721 = vmatprep.subr.mxu0 %v2626_v13  ;;  %v693_v15 = vpop.f32.mrf.mxu0 }
 0x243   :  { %v4117_v49 = vunpack.i.h.bf16 %v4115_v59  ;;  %v4116_v12 = vunpack.i.l.bf16 %v4115_v59 }
 0x244   :  { %v2625_v43 = vsel %vm2606_vm12, %v4112_v48, %v4106_v42  ;;  %v2633_v19 = vsel %vm2606_vm12, %v4087_v23, %v4111_v38  ;;  %v4168_v42 = vld [vmem:[#allocation2 + $0x18] sm:$0xff]  ;;  %v695_v13 = vpop.f32.mrf.mxu0 }
 0x245   :  { %v4120_v61 = vpop.permute.xlu1 %4119  ;;  %2722 = vmatpush1.msra.mxu0 %v2625_v43  ;;  %3258 = vmatprep.subr.mxu1 %v2633_v19  ;;  %v2623_v27 = vsel %vm2606_vm12, %v4116_v12, %v4117_v49 }
 0x246   :  { %v4122_v53 = vunpack.i.h.bf16 %v4120_v61  ;;  %v4121_v52 = vunpack.i.l.bf16 %v4120_v61  ;;  %v4125_v8 = vpop.permute.xlu0 %4124  ;;  %3259 = vmatpush3.msra.mxu1 %v2633_v19  ;;  %2723 = vmatprep.subr.mxu0 %v2623_v27 }
 0x247   :  { %v4127_v3 = vunpack.i.h.bf16 %v4125_v8  ;;  %v4126_v46 = vunpack.i.l.bf16 %v4125_v8  ;;  %v3068_v8 = vpop.f32.mrf.mxu1 }
 0x248   :  { %v2622_v20 = vsel %vm2606_vm12, %v4122_v53, %v4116_v12  ;;  %v2630_v21 = vsel %vm2606_vm12, %v4097_v0, %v4121_v52 }
 0x249   :  { %v4130_v47 = vpop.permute.xlu1 %4129  ;;  %2724 = vmatpush1.msra.mxu0 %v2622_v20  ;;  %3260 = vmatprep.subr.mxu1 %v2630_v21  ;;  %v2620_v25 = vsel %vm2606_vm12, %v4126_v46, %v4127_v3 }
 0x24a   :  { %v4132_v40 = vunpack.i.h.bf16 %v4130_v47  ;;  %v4131_v14 = vunpack.i.l.bf16 %v4130_v47  ;;  %v4135_v37 = vpop.permute.xlu0 %4134  ;;  %3261 = vmatpush3.msra.mxu1 %v2630_v21  ;;  %2725 = vmatprep.subr.mxu0 %v2620_v25 }
 0x24b   :  { %v4137_v26 = vunpack.i.h.bf16 %v4135_v37  ;;  %v4136_v6 = vunpack.i.l.bf16 %v4135_v37 }
 0x24c   :  { %v2619_v55 = vsel %vm2606_vm12, %v4132_v40, %v4126_v46  ;;  %v2627_v32 = vsel %vm2606_vm12, %v4107_v29, %v4131_v14  ;;  %v770_v46 = vpop.f32.mrf.mxu1 }
 0x24d   :  { %v4140_v7 = vpop.permute.xlu1 %4139  ;;  %2726 = vmatpush1.msra.mxu0 %v2619_v55  ;;  %3262 = vmatprep.subr.mxu1 %v2627_v32  ;;  %v2617_v39 = vsel %vm2606_vm12, %v4136_v6, %v4137_v26 }
 0x24e   :  { %v4142_v18 = vunpack.i.h.bf16 %v4140_v7  ;;  %v4141_v17 = vunpack.i.l.bf16 %v4140_v7  ;;  %v4145_v44 = vpop.permute.xlu0 %4144  ;;  %3263 = vmatpush3.msra.mxu1 %v2627_v32  ;;  %2727 = vmatprep.subr.mxu0 %v2617_v39  ;;  %v3103_v47 = vpop.f32.mrf.mxu1 }
 0x24f   :  { %v4147_v57 = vunpack.i.h.bf16 %v4145_v44  ;;  %v4146_v28 = vunpack.i.l.bf16 %v4145_v44 }
 0x250   :  { %v2616_v11 = vsel %vm2606_vm12, %v4142_v18, %v4136_v6  ;;  %v2624_v24 = vsel %vm2606_vm12, %v4117_v49, %v4141_v17  ;;  %v922_v40 = vpop.f32.mrf.mxu1 }
 0x251   :  { %v4150_v5 = vpop.permute.xlu1 %4149  ;;  %2728 = vmatpush1.msra.mxu0 %v2616_v11  ;;  %3264 = vmatprep.subr.mxu1 %v2624_v24  ;;  %v2614_v22 = vsel %vm2606_vm12, %v4146_v28, %v4147_v57  ;;  %v928_v11 = vadd.f32 %v3103_v47, %v3068_v8 }
 0x252   :  { %v4152_v2 = vunpack.i.h.bf16 %v4150_v5  ;;  %v4151_v50 = vunpack.i.l.bf16 %v4150_v5  ;;  %v2489_v54 = vpop.permute.xlu0 %2488  ;;  %3265 = vmatpush3.msra.mxu1 %v2624_v24  ;;  %2729 = vmatprep.subr.mxu0 %v2614_v22  ;;  %v3138_v37 = vpop.f32.mrf.mxu1 }
 0x254   :  { %v2613_v23 = vsel %vm2606_vm12, %v4152_v2, %v4146_v28  ;;  %v2621_v33 = vsel %vm2606_vm12, %v4127_v3, %v4151_v50  ;;  %v1302_v6 = vpop.f32.mrf.mxu1 }
 0x255   :  { %v2491_v16 = vpop.permute.xlu1 %2490  ;;  %2730 = vmatpush1.msra.mxu0 %v2613_v23  ;;  %3266 = vmatprep.subr.mxu1 %v2621_v33 }
 0x256   :  { %v4155_v4 = vpop.permute.xlu0 %4154  ;;  %3267 = vmatpush3.msra.mxu1 %v2621_v33  ;;  %v2611_v51 = vsel %vm2606_vm12, %v2489_v54, %v2491_v16 }
 0x257   :  { %v4157_v30 = vunpack.i.h.bf16 %v4155_v4  ;;  %v4156_v36 = vunpack.i.l.bf16 %v4155_v4  ;;  %2731 = vmatprep.subr.mxu0 %v2611_v51  ;;  %v1316_v4 = vadd.f32 %v3138_v37, %v928_v11 }
 0x259   :  { %v2618_v62 = vsel %vm2606_vm12, %v4137_v26, %v4156_v36  ;;  %v2615_v10 = vsel %vm2606_vm12, %v4147_v57, %v4157_v30 }
 0x25a   :  { %v2487_v31 = vpop.permute.xlu1 %2486  ;;  %v2481_v0 = vpop.permute.xlu0 %2480  ;;  %3268 = vmatprep.subr.mxu1 %v2618_v62 }
 0x25b   :  { %v2610_v60 = vsel %vm2606_vm12, %v2487_v31, %v2489_v54  ;;  %3269 = vmatpush3.msra.mxu1 %v2618_v62  ;;  %v923_v54 = vadd.f32 %v922_v40, %v770_v46 }
 0x25c   :  { %2732 = vmatpush1.msra.mxu0 %v2610_v60  ;;  %3270 = vmatprep.subr.mxu1 %v2615_v10 }
 0x25d   :  { %3271 = vmatpush3.msra.mxu1 %v2615_v10  ;;  %v1313_v60 = vadd.f32 %v1302_v6, %v923_v54 }
 0x25e   :  { %v2483_v41 = vpop.permute.xlu1 %2482 }
 0x25f   :  { %v2479_v63 = vpop.permute.xlu0 %2478  ;;  %v2608_v1 = vsel %vm2606_vm12, %v2481_v0, %v2483_v41 }
 0x260   :  { %v2607_v35 = vsel %vm2606_vm12, %v2479_v63, %v2481_v0  ;;  %2733 = vmatprep.subr.mxu0 %v2608_v1 }
 0x261   :  { %2734 = vmatpush1.msra.mxu0 %v2607_v35 }
 0x262   :  { %v2493_v58 = vpop.permute.xlu1 %2492  ;;  %2768 = vmatmul.mubr.f32.vlgmr.msra.gmra.mxu0 %v5574_v9  ;;  %v699_v9 = vpop.f32.mrf.mxu0 }
 0x263   :  { %v2485_v34 = vpop.permute.xlu0 %2484  ;;  %v2612_v29 = vsel %vm2606_vm12, %v2491_v16, %v2493_v58  ;;  %2773 = vmatprep.mubr.f32.mxu0 %v4168_v42 }
 0x264   :  { %3272 = vmatprep.subr.mxu1 %v2612_v29  ;;  %v2609_v45 = vsel %vm2606_vm12, %v2483_v41, %v2485_v34  ;;  %v701_v48 = vpop.f32.mrf.mxu0 }
 0x265   :  { %3273 = vmatpush3.msra.mxu1 %v2612_v29 }
 0x266   :  { %2774 = vmatmul.mubr.f32.gmra.mxu0 %v2907_v56  ;;  %3274 = vmatprep.subr.mxu1 %v2609_v45  ;;  %v845_v38 = vpop.f32.mrf.mxu0 }
 0x267   :  { %3275 = vmatpush3.msra.mxu1 %v2609_v45  ;;  %v846_v7 = vadd.f32 %v845_v38, %v693_v15 }
 0x268   :  { %3277 = vmatmul.mubr.f32.vlgmr.msra.gmra.mxu1 %v2907_v56  ;;  %v847_v59 = vpop.f32.mrf.mxu0 }
 0x269   :  { %v848_v18 = vadd.f32 %v847_v59, %v695_v13 }
 0x26a   :  { %v851_v49 = vpop.f32.mrf.mxu0 }
 0x26b   :  { %v852_v17 = vadd.f32 %v851_v49, %v699_v9 }
 0x26c   :  { %v853_v12 = vpop.f32.mrf.mxu0 }
 0x26d   :  { %v854_v57 = vadd.f32 %v853_v12, %v701_v48 }
 0x26e   :  { %v1225_v43 = vpop.f32.mrf.mxu0 }
 0x26f   :  { %v1311_v28 = vadd.f32 %v1225_v43, %v846_v7 }
 0x270   :  { %v1227_v19 = vpop.f32.mrf.mxu0  ;;  %v3173_v32 = vpop.f32.mrf.mxu1 }
 0x271   :  { %v1312_v22 = vadd.f32 %v1227_v19, %v848_v18  ;;  %v1702_v10 = vadd.f32 %v3173_v32, %v1316_v4 }
 0x272   :  { %v1231_v61 = vpop.f32.mrf.mxu0  ;;  %v1688_v44 = vpop.f32.mrf.mxu1 }
 0x273   :  { %v1314_v2 = vadd.f32 %v1231_v61, %v852_v17  ;;  %v1699_v29 = vadd.f32 %v1688_v44, %v1313_v60 }
 0x274   :  { %v1233_v27 = vpop.f32.mrf.mxu0 }
 0x275   :  { %v1315_v23 = vadd.f32 %v1233_v27, %v854_v57 }
 0x276   :  { %v1611_v53 = vpop.f32.mrf.mxu0 }
 0x277   :  { %v1697_v50 = vadd.f32 %v1611_v53, %v1311_v28 }
 0x278   :  { %v1613_v52 = vpop.f32.mrf.mxu0 }
 0x279   :  { %v1698_v33 = vadd.f32 %v1613_v52, %v1312_v22 }
 0x27f   :  { %v1617_v3 = vpop.f32.mrf.mxu0 }
 0x280   :  { %v1700_v36 = vadd.f32 %v1617_v3, %v1314_v2 }
 0x281   :  { %v1619_v20 = vpop.f32.mrf.mxu0 }
 0x282   :  { %v1701_v1 = vadd.f32 %v1619_v20, %v1315_v23 }
 0x283   :  { %v2866_v0 = vpop.permute.xlu1 %2865 }
 0x284   :  { %v2871_v48 = vpop.permute.xlu0 %2870 }
 0x29d   :  { %v1997_v21 = vpop.f32.mrf.mxu0 }
 0x29e   :  { %v2083_v16 = vadd.f32 %v1997_v21, %v1697_v50 }
 0x29f   :  { %v1999_v25 = vpop.f32.mrf.mxu0 }
 0x2a0   :  { %v2084_v62 = vadd.f32 %v1999_v25, %v1698_v33 }
 0x2a3   :  { %v2003_v14 = vpop.f32.mrf.mxu0 }
 0x2a4   :  { %v2086_v35 = vadd.f32 %v2003_v14, %v1700_v36 }
 0x2a5   :  { %v2005_v26 = vpop.f32.mrf.mxu0  ;;  %v3208_v24 = vpop.f32.mrf.mxu1 }
 0x2a6   :  { %v2088_v42 = vadd.f32 %v3208_v24, %v1702_v10  ;;  %v2087_v45 = vadd.f32 %v2005_v26, %v1701_v1 }
 0x2a7   :  { %v2074_v51 = vpop.f32.mrf.mxu1 }
 0x2a8   :  { %v2085_v38 = vadd.f32 %v2074_v51, %v1699_v29 }
 0x2d8   :  { %v2383_v55 = vpop.f32.mrf.mxu0 }
 0x2d9   :  { %v2469_v31 = vadd.f32 %v2383_v55, %v2083_v16 }
 0x2da   :  { %v2385_v39 = vpop.f32.mrf.mxu0 }
 0x2db   :  { %v2470_v58 = vadd.f32 %v2385_v39, %v2084_v62 }
 0x2dc   :  { %v2389_v5 = vpop.f32.mrf.mxu0 }
 0x2dd   :  { %v2472_v15 = vadd.f32 %v2389_v5, %v2086_v35 }
 0x2de   :  { %v2391_v30 = vpop.f32.mrf.mxu0  ;;  %v3243_v41 = vpop.f32.mrf.mxu1 }
 0x2df   :  { %v2474_v12 = vadd.f32 %v3243_v41, %v2088_v42  ;;  %v2473_v43 = vadd.f32 %v2391_v30, %v2087_v45 }
 0x2e0   :  { %v2460_v59 = vpop.f32.mrf.mxu1 }
 0x2e1   :  { %v2471_v52 = vadd.f32 %v2460_v59, %v2085_v38 }
 0x322   :  { %v2769_v63 = vpop.f32.mrf.mxu0 }
 0x323   :  { %v2855_v34 = vadd.f32 %v2769_v63, %v2469_v31 }
 0x324   :  { %v2771_v56 = vpop.f32.mrf.mxu0 }
 0x325   :  { %v2873_v13 = vadd.f32 %v2866_v0, %v2855_v34  ;;  %v2856_v9 = vadd.f32 %v2771_v56, %v2470_v58 }
 0x326   :  { %v2775_v49 = vpop.f32.mrf.mxu0 }
 0x327   :  { %2879 = vst [vmem:[%s5654_s3] sm:$0xff] %v2873_v13  ;;  %v2874_v19 = vadd.f32 %v2866_v0, %v2856_v9  ;;  %v2858_v61 = vadd.f32 %v2775_v49, %v2472_v15 }
 0x328   :  { %v2777_v27 = vpop.f32.mrf.mxu0  ;;  %v3278_v53 = vpop.f32.mrf.mxu1 }
 0x329   :  { %2880 = vst [vmem:[%s5654_s3 + $0x8] sm:$0xff] %v2874_v19  ;;  %v2876_v8 = vadd.f32 %v2871_v48, %v2858_v61  ;;  %v2859_v3 = vadd.f32 %v2777_v27, %v2473_v43  ;;  %v2860_v46 = vadd.f32 %v3278_v53, %v2474_v12 }
 0x32a   :  { %v2846_v20 = vpop.f32.mrf.mxu1 }
 0x32b   :  { %2882 = vst [vmem:[%s5654_s3 + $0x18] sm:$0xff] %v2876_v8  ;;  %v2877_v21 = vadd.f32 %v2871_v48, %v2859_v3  ;;  %v2878_v47 = vadd.f32 %v2871_v48, %v2860_v46  ;;  %v2857_v25 = vadd.f32 %v2846_v20, %v2471_v52 }
 0x32d   :  { %2883 = vst [vmem:[%s5654_s3 + $0x20] sm:$0xff] %v2877_v21  ;;  %2884 = vst [vmem:[%s5654_s3 + $0x28] sm:$0xff] %v2878_v47  ;;  %v2875_v40 = vadd.f32 %v2866_v0, %v2857_v25 }
 0x32f   :  { %2881 = vst [vmem:[%s5654_s3 + $0x10] sm:$0xff] %v2875_v40 }

</bundles_post_ra>
